<compile_context>
chip_gen: v7x
topology: tpu7x:2x2x1
jax: 0.10.0
libtpu: 0.0.40
codegen_flags: <defaults>
</compile_context>

<pallas_src>
import jax
import jax.numpy as jnp
from jax.experimental import pallas as pl
from jax.experimental.pallas import tpu as pltpu

LEAKY_SLOPE = 0.01  # nn.LeakyReLU default negative_slope used by get_mlp
LANE = 128


def _round_up(n, m):
    return ((n + m - 1) // m) * m


# ---------------------------------------------------------------------------
# Kernel: fused 7-layer MLP. One grid step processes a (tb, d_in_pad) row
# tile; all weights/biases use a constant block index so they stay
# VMEM-resident across the whole grid.
# ---------------------------------------------------------------------------
def _mlp_kernel(x_ref, *refs):
    out_ref = refs[-1]
    param_refs = refs[:-1]          # w0, b0, w1, b1, ..., w6, b6
    n_layers = len(param_refs) // 2

    h = x_ref[...].astype(jnp.bfloat16)          # bf16 MXU operands
    for i in range(n_layers):
        w = param_refs[2 * i][...]               # bf16 (K_pad, N_pad)
        b = param_refs[2 * i + 1][...]           # f32  (1, N_pad)
        acc = jnp.dot(h, w, preferred_element_type=jnp.float32) + b
        if i < n_layers - 1:
            hb = acc.astype(jnp.bfloat16)
            h = jnp.maximum(hb, LEAKY_SLOPE * hb)   # LeakyReLU: 1 mul + 1 max
        else:
            out_ref[...] = acc.astype(out_ref.dtype)


def _pick_tb(rows):
    # Largest tile from this ladder that still yields >= 2 grid steps:
    #  - >= 2 steps keeps both v7x TensorCores busy on the "parallel" axis
    #    and lets input/output DMA overlap compute;
    #  - 256/512-row tiles amortize the ~0.35 us per-step overhead and fill
    #    the 256-tall MXU on v6e/v7x.
    for tb in (512, 256, 128, 64, 32, 16, 8):
        if rows >= 2 * tb:
            return tb
    return 8


@jax.jit
def _mlp_pallas(x, flat_params):
    """x: (rows, d_in) f32.  flat_params: [w0,b0,...,w6,b6] (lane-padded)."""
    rows, d_in = x.shape
    d_in_pad = flat_params[0].shape[0]
    n_out_pad = flat_params[-1].shape[-1]

    tb = _pick_tb(rows)
    rows_pad = _round_up(rows, tb)
    if rows_pad != rows or d_in_pad != d_in:
        # Zero padding: rows are sliced off outside; extra input columns hit
        # zero weight rows, so the math is exact.
        x = jnp.pad(x, ((0, rows_pad - rows), (0, d_in_pad - d_in)))
    grid = (rows_pad // tb,)

    in_specs = [pl.BlockSpec((tb, d_in_pad), lambda i: (i, 0))]
    for p in flat_params:
        # Full-array block, constant index -> resident across all grid steps.
        in_specs.append(pl.BlockSpec(p.shape, lambda i: (0, 0)))
    out_specs = pl.BlockSpec((tb, n_out_pad), lambda i: (i, 0))

    n_layers = len(flat_params) // 2
    flops = 2 * rows_pad * sum(
        flat_params[2 * i].shape[0] * flat_params[2 * i].shape[1]
        for i in range(n_layers))
    bytes_accessed = (
        x.size * x.dtype.itemsize
        + sum(p.size * p.dtype.itemsize for p in flat_params)
        + rows_pad * n_out_pad * 4)

    # Explicit scoped-VMEM budget: weights (x2, in case Pallas double-buffers
    # the constant-index blocks) + double-buffered input/output tiles +
    # generous room for live intermediates and compiler scratch.
    weight_bytes = sum(p.size * p.dtype.itemsize for p in flat_params)
    max_width = max(p.shape[-1] for p in flat_params)
    io_block_bytes = 2 * tb * (d_in_pad + n_out_pad) * 4
    interm_bytes = 6 * tb * max_width * 4
    vmem_limit = int(min(2 * weight_bytes + io_block_bytes + interm_bytes
                         + (16 << 20), 64 << 20))

    return pl.pallas_call(
        _mlp_kernel,
        out_shape=jax.ShapeDtypeStruct((rows_pad, n_out_pad), jnp.float32),
        grid=grid,
        in_specs=in_specs,
        out_specs=out_specs,
        compiler_params=pltpu.CompilerParams(
            dimension_semantics=("parallel",),
            vmem_limit_bytes=vmem_limit),
        cost_estimate=pl.CostEstimate(
            flops=flops, transcendentals=0, bytes_accessed=bytes_accessed),
    )(x, *flat_params)


# ---------------------------------------------------------------------------
# Public forward: mirrors ContrastiveLearningModel.forward semantics.
# Tuple/list inputs are fused into ONE pallas_call (stacked along batch).
# ---------------------------------------------------------------------------
def contrastive_model_forward(x, padded_params, d_out):
    flat = []
    for w, b in padded_params:
        flat.append(w)
        flat.append(b)

    if isinstance(x, (list, tuple)):
        sizes = [xi.shape[0] for xi in x]
        x_stacked = jnp.concatenate(list(x), axis=0)
        y = _mlp_pallas(x_stacked, flat)
        outs, off = [], 0
        for n in sizes:
            outs.append(y[off:off + n, :d_out])
            off += n
        return tuple(outs)

    y = _mlp_pallas(x, flat)
    return y[:x.shape[0], :d_out]


# ---------------------------------------------------------------------------
# Parameter construction (synthetic init, matching torch.nn.Linear defaults).
# ---------------------------------------------------------------------------
def init_raw_params(latent_dim, key, dtype=jnp.float32):
    dims = [latent_dim,
            latent_dim * 10, latent_dim * 50, latent_dim * 50,
            latent_dim * 50, latent_dim * 50, latent_dim * 10,
            latent_dim]
    params = []
    for i in range(len(dims) - 1):
        n_in, n_out = dims[i], dims[i + 1]
        key, kw, kb = jax.random.split(key, 3)
        bound = 1.0 / jnp.sqrt(n_in)
        w = jax.random.uniform(kw, (n_in, n_out), dtype, -bound, bound)
        b = jax.random.uniform(kb, (n_out,), dtype, -bound, bound)
        params.append((w, b))
    return params


def prepare_params(raw_params):
    """Zero-pad all in/hidden/out widths to multiples of 128, cast W to bf16.

    Zero padding keeps the math exact: padded activation columns are 0
    (zero weights + zero bias, LeakyReLU(0)=0) and padded K rows of the next
    layer are zero, so they contribute nothing.
    """
    dims = [raw_params[0][0].shape[0]] + [w.shape[1] for w, _ in raw_params]
    d_out = dims[-1]
    pad_dims = [_round_up(d, LANE) for d in dims]

    padded = []
    for i, (w, b) in enumerate(raw_params):
        k, n = w.shape
        kp, np_ = pad_dims[i], pad_dims[i + 1]
        w_p = jnp.zeros((kp, np_), jnp.bfloat16).at[:k, :n].set(
            w.astype(jnp.bfloat16))
        b_p = jnp.zeros((1, np_), jnp.float32).at[:, :n].set(
            b.reshape(1, -1).astype(jnp.float32))
        padded.append((w_p, b_p))
    return padded, d_out


if __name__ == "__main__":
    latent_dim = 8
    batch = 16

    key = jax.random.PRNGKey(0)
    key, kx1, kx2, kbig, kp = jax.random.split(key, 5)

    raw_params = init_raw_params(latent_dim, kp)
    padded_params, d_out = prepare_params(raw_params)
    d_in_pad = padded_params[0][0].shape[0]

    x1 = jax.random.normal(kx1, (batch, latent_dim), jnp.float32)
    x2 = jax.random.normal(kx2, (batch, latent_dim), jnp.float32)

    # Tuple path: one fused pallas_call over the stacked inputs.
    y1, y2 = contrastive_model_forward((x1, x2), padded_params, d_out)
    jax.block_until_ready((y1, y2))
    assert y1.shape == (batch, latent_dim) and y2.shape == (batch, latent_dim)

    # Single-array path.
    y_single = contrastive_model_forward(x1, padded_params, d_out)
    jax.block_until_ready(y_single)
    assert y_single.shape == (batch, latent_dim)
    assert jnp.allclose(y_single, y1, atol=1e-5, rtol=1e-5)

    # Reference 1: same bf16 padded weights + bf16 activation, plain JAX
    # (structurally identical to the kernel -> tight tolerance).
    def ref_bf16(xx):
        h = jnp.pad(xx, ((0, 0), (0, d_in_pad - xx.shape[1])))
        h = h.astype(jnp.bfloat16)
        out = None
        for i, (w, b) in enumerate(padded_params):
            acc = jnp.dot(h, w, preferred_element_type=jnp.float32) + b
            if i < len(padded_params) - 1:
                hb = acc.astype(jnp.bfloat16)
                h = jnp.maximum(hb, LEAKY_SLOPE * hb)
            else:
                out = acc
        return out[:, :d_out]

    # Reference 2: original f32 weights (loose tolerance for bf16 operands).
    def ref_f32(xx):
        h = xx
        for i, (w, b) in enumerate(raw_params):
            h = h @ w + b.reshape(1, -1)
            if i < len(raw_params) - 1:
                h = jnp.where(h > 0, h, LEAKY_SLOPE * h)
        return h

    assert jnp.allclose(y1, ref_bf16(x1), atol=2e-3, rtol=2e-3)
    assert jnp.allclose(y2, ref_bf16(x2), atol=2e-3, rtol=2e-3)
    assert jnp.allclose(y1, ref_f32(x1), atol=1e-1, rtol=1e-1)
    assert jnp.allclose(y2, ref_f32(x2), atol=1e-1, rtol=1e-1)

    # Large-batch smoke test: exercises the 512-row tile path (grid of 2
    # "parallel" steps -> both v7x TensorCores) on the same parameters.
    big = 1024
    x_big = jax.random.normal(kbig, (big, latent_dim), jnp.float32)
    y_big = contrastive_model_forward(x_big, padded_params, d_out)
    jax.block_until_ready(y_big)
    assert y_big.shape == (big, latent_dim)
    assert jnp.allclose(y_big[:32], ref_bf16(x_big[:32]), atol=2e-3, rtol=2e-3)

    print("KERNEL_OK")
</pallas_src>

<mosaic_0001>
module attributes {stable_mosaic.version = 11 : i64} {
  func.func @_mlp_kernel(%arg0: i32, %arg1: memref<16x128xf32, #tpu.memory_space<vmem>>, %arg2: memref<128x128xbf16, #tpu.memory_space<vmem>>, %arg3: memref<1x128xf32, #tpu.memory_space<vmem>>, %arg4: memref<128x512xbf16, #tpu.memory_space<vmem>>, %arg5: memref<1x512xf32, #tpu.memory_space<vmem>>, %arg6: memref<512x512xbf16, #tpu.memory_space<vmem>>, %arg7: memref<1x512xf32, #tpu.memory_space<vmem>>, %arg8: memref<512x512xbf16, #tpu.memory_space<vmem>>, %arg9: memref<1x512xf32, #tpu.memory_space<vmem>>, %arg10: memref<512x512xbf16, #tpu.memory_space<vmem>>, %arg11: memref<1x512xf32, #tpu.memory_space<vmem>>, %arg12: memref<512x128xbf16, #tpu.memory_space<vmem>>, %arg13: memref<1x128xf32, #tpu.memory_space<vmem>>, %arg14: memref<128x128xbf16, #tpu.memory_space<vmem>>, %arg15: memref<1x128xf32, #tpu.memory_space<vmem>>, %arg16: memref<16x128xf32, #tpu.memory_space<vmem>>) attributes {dimension_semantics = [#tpu.dimension_semantics<parallel>], iteration_bounds = array<i64: 2>, scalar_prefetch = 0 : i64, scratch_operands = 0 : i64, tpu.core_type = #tpu.core_type<tc>, window_params = [{transform_indices = @transform_0, window_bounds = array<i64: 16, 128>}, {pipeline_mode = #tpu.pipeline_mode<synchronous>, transform_indices = @transform_1, window_bounds = array<i64: 128, 128>}, {pipeline_mode = #tpu.pipeline_mode<synchronous>, transform_indices = @transform_2, window_bounds = array<i64: 1, 128>}, {pipeline_mode = #tpu.pipeline_mode<synchronous>, transform_indices = @transform_3, window_bounds = array<i64: 128, 512>}, {pipeline_mode = #tpu.pipeline_mode<synchronous>, transform_indices = @transform_4, window_bounds = array<i64: 1, 512>}, {pipeline_mode = #tpu.pipeline_mode<synchronous>, transform_indices = @transform_5, window_bounds = array<i64: 512, 512>}, {pipeline_mode = #tpu.pipeline_mode<synchronous>, transform_indices = @transform_6, window_bounds = array<i64: 1, 512>}, {pipeline_mode = #tpu.pipeline_mode<synchronous>, transform_indices = @transform_7, window_bounds = array<i64: 512, 512>}, {pipeline_mode = #tpu.pipeline_mode<synchronous>, transform_indices = @transform_8, window_bounds = array<i64: 1, 512>}, {pipeline_mode = #tpu.pipeline_mode<synchronous>, transform_indices = @transform_9, window_bounds = array<i64: 512, 512>}, {pipeline_mode = #tpu.pipeline_mode<synchronous>, transform_indices = @transform_10, window_bounds = array<i64: 1, 512>}, {pipeline_mode = #tpu.pipeline_mode<synchronous>, transform_indices = @transform_11, window_bounds = array<i64: 512, 128>}, {pipeline_mode = #tpu.pipeline_mode<synchronous>, transform_indices = @transform_12, window_bounds = array<i64: 1, 128>}, {pipeline_mode = #tpu.pipeline_mode<synchronous>, transform_indices = @transform_13, window_bounds = array<i64: 128, 128>}, {pipeline_mode = #tpu.pipeline_mode<synchronous>, transform_indices = @transform_14, window_bounds = array<i64: 1, 128>}, {transform_indices = @transform_15, window_bounds = array<i64: 16, 128>}]} {
    %c0 = arith.constant 0 : index
    %c0_0 = arith.constant 0 : index
    %0 = vector.load %arg1[%c0, %c0_0] : memref<16x128xf32, #tpu.memory_space<vmem>>, vector<16x128xf32>
    %1 = arith.truncf %0 : vector<16x128xf32> to vector<16x128xbf16>
    %c0_1 = arith.constant 0 : index
    %c0_2 = arith.constant 0 : index
    %2 = vector.load %arg2[%c0_1, %c0_2] : memref<128x128xbf16, #tpu.memory_space<vmem>>, vector<128x128xbf16>
    %c0_3 = arith.constant 0 : index
    %c0_4 = arith.constant 0 : index
    %3 = vector.load %arg3[%c0_3, %c0_4] : memref<1x128xf32, #tpu.memory_space<vmem>>, vector<1x128xf32>
    %cst = arith.constant dense<0.000000e+00> : vector<16x128xf32>
    %4 = tpu.matmul %1, %2, %cst {dimension_numbers = #tpu.dot_dimension_numbers<[1], [0], [0], [1], [0, 0, 1, 1], [], []>} : vector<16x128xbf16>, vector<128x128xbf16>, vector<16x128xf32> -> vector<16x128xf32>
    %5 = vector.broadcast %3 : vector<1x128xf32> to vector<16x128xf32>
    %6 = arith.addf %4, %5 : vector<16x128xf32>
    %7 = arith.truncf %6 : vector<16x128xf32> to vector<16x128xbf16>
    %cst_5 = arith.constant 1.000980e-02 : bf16
    %8 = vector.broadcast %cst_5 : bf16 to vector<16x128xbf16>
    %9 = arith.mulf %8, %7 : vector<16x128xbf16>
    %10 = arith.maximumf %7, %9 : vector<16x128xbf16>
    %c0_6 = arith.constant 0 : index
    %c0_7 = arith.constant 0 : index
    %11 = vector.load %arg4[%c0_6, %c0_7] : memref<128x512xbf16, #tpu.memory_space<vmem>>, vector<128x512xbf16>
    %c0_8 = arith.constant 0 : index
    %c0_9 = arith.constant 0 : index
    %12 = vector.load %arg5[%c0_8, %c0_9] : memref<1x512xf32, #tpu.memory_space<vmem>>, vector<1x512xf32>
    %cst_10 = arith.constant dense<0.000000e+00> : vector<16x512xf32>
    %13 = tpu.matmul %10, %11, %cst_10 {dimension_numbers = #tpu.dot_dimension_numbers<[1], [0], [0], [1], [0, 0, 1, 1], [], []>} : vector<16x128xbf16>, vector<128x512xbf16>, vector<16x512xf32> -> vector<16x512xf32>
    %14 = vector.broadcast %12 : vector<1x512xf32> to vector<16x512xf32>
    %15 = arith.addf %13, %14 : vector<16x512xf32>
    %16 = arith.truncf %15 : vector<16x512xf32> to vector<16x512xbf16>
    %cst_11 = arith.constant 1.000980e-02 : bf16
    %17 = vector.broadcast %cst_11 : bf16 to vector<16x512xbf16>
    %18 = arith.mulf %17, %16 : vector<16x512xbf16>
    %19 = arith.maximumf %16, %18 : vector<16x512xbf16>
    %c0_12 = arith.constant 0 : index
    %c0_13 = arith.constant 0 : index
    %20 = vector.load %arg6[%c0_12, %c0_13] : memref<512x512xbf16, #tpu.memory_space<vmem>>, vector<512x512xbf16>
    %c0_14 = arith.constant 0 : index
    %c0_15 = arith.constant 0 : index
    %21 = vector.load %arg7[%c0_14, %c0_15] : memref<1x512xf32, #tpu.memory_space<vmem>>, vector<1x512xf32>
    %cst_16 = arith.constant dense<0.000000e+00> : vector<16x512xf32>
    %22 = tpu.matmul %19, %20, %cst_16 {dimension_numbers = #tpu.dot_dimension_numbers<[1], [0], [0], [1], [0, 0, 1, 1], [], []>} : vector<16x512xbf16>, vector<512x512xbf16>, vector<16x512xf32> -> vector<16x512xf32>
    %23 = vector.broadcast %21 : vector<1x512xf32> to vector<16x512xf32>
    %24 = arith.addf %22, %23 : vector<16x512xf32>
    %25 = arith.truncf %24 : vector<16x512xf32> to vector<16x512xbf16>
    %cst_17 = arith.constant 1.000980e-02 : bf16
    %26 = vector.broadcast %cst_17 : bf16 to vector<16x512xbf16>
    %27 = arith.mulf %26, %25 : vector<16x512xbf16>
    %28 = arith.maximumf %25, %27 : vector<16x512xbf16>
    %c0_18 = arith.constant 0 : index
    %c0_19 = arith.constant 0 : index
    %29 = vector.load %arg8[%c0_18, %c0_19] : memref<512x512xbf16, #tpu.memory_space<vmem>>, vector<512x512xbf16>
    %c0_20 = arith.constant 0 : index
    %c0_21 = arith.constant 0 : index
    %30 = vector.load %arg9[%c0_20, %c0_21] : memref<1x512xf32, #tpu.memory_space<vmem>>, vector<1x512xf32>
    %cst_22 = arith.constant dense<0.000000e+00> : vector<16x512xf32>
    %31 = tpu.matmul %28, %29, %cst_22 {dimension_numbers = #tpu.dot_dimension_numbers<[1], [0], [0], [1], [0, 0, 1, 1], [], []>} : vector<16x512xbf16>, vector<512x512xbf16>, vector<16x512xf32> -> vector<16x512xf32>
    %32 = vector.broadcast %30 : vector<1x512xf32> to vector<16x512xf32>
    %33 = arith.addf %31, %32 : vector<16x512xf32>
    %34 = arith.truncf %33 : vector<16x512xf32> to vector<16x512xbf16>
    %cst_23 = arith.constant 1.000980e-02 : bf16
    %35 = vector.broadcast %cst_23 : bf16 to vector<16x512xbf16>
    %36 = arith.mulf %35, %34 : vector<16x512xbf16>
    %37 = arith.maximumf %34, %36 : vector<16x512xbf16>
    %c0_24 = arith.constant 0 : index
    %c0_25 = arith.constant 0 : index
    %38 = vector.load %arg10[%c0_24, %c0_25] : memref<512x512xbf16, #tpu.memory_space<vmem>>, vector<512x512xbf16>
    %c0_26 = arith.constant 0 : index
    %c0_27 = arith.constant 0 : index
    %39 = vector.load %arg11[%c0_26, %c0_27] : memref<1x512xf32, #tpu.memory_space<vmem>>, vector<1x512xf32>
    %cst_28 = arith.constant dense<0.000000e+00> : vector<16x512xf32>
    %40 = tpu.matmul %37, %38, %cst_28 {dimension_numbers = #tpu.dot_dimension_numbers<[1], [0], [0], [1], [0, 0, 1, 1], [], []>} : vector<16x512xbf16>, vector<512x512xbf16>, vector<16x512xf32> -> vector<16x512xf32>
    %41 = vector.broadcast %39 : vector<1x512xf32> to vector<16x512xf32>
    %42 = arith.addf %40, %41 : vector<16x512xf32>
    %43 = arith.truncf %42 : vector<16x512xf32> to vector<16x512xbf16>
    %cst_29 = arith.constant 1.000980e-02 : bf16
    %44 = vector.broadcast %cst_29 : bf16 to vector<16x512xbf16>
    %45 = arith.mulf %44, %43 : vector<16x512xbf16>
    %46 = arith.maximumf %43, %45 : vector<16x512xbf16>
    %c0_30 = arith.constant 0 : index
    %c0_31 = arith.constant 0 : index
    %47 = vector.load %arg12[%c0_30, %c0_31] : memref<512x128xbf16, #tpu.memory_space<vmem>>, vector<512x128xbf16>
    %c0_32 = arith.constant 0 : index
    %c0_33 = arith.constant 0 : index
    %48 = vector.load %arg13[%c0_32, %c0_33] : memref<1x128xf32, #tpu.memory_space<vmem>>, vector<1x128xf32>
    %cst_34 = arith.constant dense<0.000000e+00> : vector<16x128xf32>
    %49 = tpu.matmul %46, %47, %cst_34 {dimension_numbers = #tpu.dot_dimension_numbers<[1], [0], [0], [1], [0, 0, 1, 1], [], []>} : vector<16x512xbf16>, vector<512x128xbf16>, vector<16x128xf32> -> vector<16x128xf32>
    %50 = vector.broadcast %48 : vector<1x128xf32> to vector<16x128xf32>
    %51 = arith.addf %49, %50 : vector<16x128xf32>
    %52 = arith.truncf %51 : vector<16x128xf32> to vector<16x128xbf16>
    %cst_35 = arith.constant 1.000980e-02 : bf16
    %53 = vector.broadcast %cst_35 : bf16 to vector<16x128xbf16>
    %54 = arith.mulf %53, %52 : vector<16x128xbf16>
    %55 = arith.maximumf %52, %54 : vector<16x128xbf16>
    %c0_36 = arith.constant 0 : index
    %c0_37 = arith.constant 0 : index
    %56 = vector.load %arg14[%c0_36, %c0_37] : memref<128x128xbf16, #tpu.memory_space<vmem>>, vector<128x128xbf16>
    %c0_38 = arith.constant 0 : index
    %c0_39 = arith.constant 0 : index
    %57 = vector.load %arg15[%c0_38, %c0_39] : memref<1x128xf32, #tpu.memory_space<vmem>>, vector<1x128xf32>
    %cst_40 = arith.constant dense<0.000000e+00> : vector<16x128xf32>
    %58 = tpu.matmul %55, %56, %cst_40 {dimension_numbers = #tpu.dot_dimension_numbers<[1], [0], [0], [1], [0, 0, 1, 1], [], []>} : vector<16x128xbf16>, vector<128x128xbf16>, vector<16x128xf32> -> vector<16x128xf32>
    %59 = vector.broadcast %57 : vector<1x128xf32> to vector<16x128xf32>
    %60 = arith.addf %58, %59 : vector<16x128xf32>
    %c0_41 = arith.constant 0 : index
    %c0_42 = arith.constant 0 : index
    %61 = vector.load %arg16[%c0_41, %c0_42] : memref<16x128xf32, #tpu.memory_space<vmem>>, vector<16x128xf32>
    tpu.vector_store %arg16[%c0_41, %c0_42], %60 {strides = array<i32>} : memref<16x128xf32, #tpu.memory_space<vmem>>, vector<16x128xf32>,
    return
  }
  func.func @transform_0(%arg0: i32) -> (i32, i32) {
    %c0_i32 = arith.constant 0 : i32
    %c0_i32_0 = arith.constant 0 : i32
    return %arg0, %c0_i32 : i32, i32
  }
  func.func @transform_1(%arg0: i32) -> (i32, i32) {
    %c0_i32 = arith.constant 0 : i32
    %c0_i32_0 = arith.constant 0 : i32
    %c0_i32_1 = arith.constant 0 : i32
    return %c0_i32, %c0_i32_0 : i32, i32
  }
  func.func @transform_2(%arg0: i32) -> (i32, i32) {
    %c0_i32 = arith.constant 0 : i32
    %c0_i32_0 = arith.constant 0 : i32
    %c0_i32_1 = arith.constant 0 : i32
    return %c0_i32, %c0_i32_0 : i32, i32
  }
  func.func @transform_3(%arg0: i32) -> (i32, i32) {
    %c0_i32 = arith.constant 0 : i32
    %c0_i32_0 = arith.constant 0 : i32
    %c0_i32_1 = arith.constant 0 : i32
    return %c0_i32, %c0_i32_0 : i32, i32
  }
  func.func @transform_4(%arg0: i32) -> (i32, i32) {
    %c0_i32 = arith.constant 0 : i32
    %c0_i32_0 = arith.constant 0 : i32
    %c0_i32_1 = arith.constant 0 : i32
    return %c0_i32, %c0_i32_0 : i32, i32
  }
  func.func @transform_5(%arg0: i32) -> (i32, i32) {
    %c0_i32 = arith.constant 0 : i32
    %c0_i32_0 = arith.constant 0 : i32
    %c0_i32_1 = arith.constant 0 : i32
    return %c0_i32, %c0_i32_0 : i32, i32
  }
  func.func @transform_6(%arg0: i32) -> (i32, i32) {
    %c0_i32 = arith.constant 0 : i32
    %c0_i32_0 = arith.constant 0 : i32
    %c0_i32_1 = arith.constant 0 : i32
    return %c0_i32, %c0_i32_0 : i32, i32
  }
  func.func @transform_7(%arg0: i32) -> (i32, i32) {
    %c0_i32 = arith.constant 0 : i32
    %c0_i32_0 = arith.constant 0 : i32
    %c0_i32_1 = arith.constant 0 : i32
    return %c0_i32, %c0_i32_0 : i32, i32
  }
  func.func @transform_8(%arg0: i32) -> (i32, i32) {
    %c0_i32 = arith.constant 0 : i32
    %c0_i32_0 = arith.constant 0 : i32
    %c0_i32_1 = arith.constant 0 : i32
    return %c0_i32, %c0_i32_0 : i32, i32
  }
  func.func @transform_9(%arg0: i32) -> (i32, i32) {
    %c0_i32 = arith.constant 0 : i32
    %c0_i32_0 = arith.constant 0 : i32
    %c0_i32_1 = arith.constant 0 : i32
    return %c0_i32, %c0_i32_0 : i32, i32
  }
  func.func @transform_10(%arg0: i32) -> (i32, i32) {
    %c0_i32 = arith.constant 0 : i32
    %c0_i32_0 = arith.constant 0 : i32
    %c0_i32_1 = arith.constant 0 : i32
    return %c0_i32, %c0_i32_0 : i32, i32
  }
  func.func @transform_11(%arg0: i32) -> (i32, i32) {
    %c0_i32 = arith.constant 0 : i32
    %c0_i32_0 = arith.constant 0 : i32
    %c0_i32_1 = arith.constant 0 : i32
    return %c0_i32, %c0_i32_0 : i32, i32
  }
  func.func @transform_12(%arg0: i32) -> (i32, i32) {
    %c0_i32 = arith.constant 0 : i32
    %c0_i32_0 = arith.constant 0 : i32
    %c0_i32_1 = arith.constant 0 : i32
    return %c0_i32, %c0_i32_0 : i32, i32
  }
  func.func @transform_13(%arg0: i32) -> (i32, i32) {
    %c0_i32 = arith.constant 0 : i32
    %c0_i32_0 = arith.constant 0 : i32
    %c0_i32_1 = arith.constant 0 : i32
    return %c0_i32, %c0_i32_0 : i32, i32
  }
  func.func @transform_14(%arg0: i32) -> (i32, i32) {
    %c0_i32 = arith.constant 0 : i32
    %c0_i32_0 = arith.constant 0 : i32
    %c0_i32_1 = arith.constant 0 : i32
    return %c0_i32, %c0_i32_0 : i32, i32
  }
  func.func @transform_15(%arg0: i32) -> (i32, i32) {
    %c0_i32 = arith.constant 0 : i32
    %c0_i32_0 = arith.constant 0 : i32
    return %arg0, %c0_i32 : i32, i32
  }
}

</mosaic_0001>

<bundles_post_ra>
// kernel: _mlp_pallas.1
= control target key start
LH: loop header
LB: loop body
LE: loop exit
PB: predicated region body
PF: predicated region fallthrough
CT: control target
= control target key end

     0   :  { %s6769_s0 = inlined_call_operand.vmem [shape: f32[32,128], index: 0, kind: input, shape index: {}]   ;;  %s6770_s1 = inlined_call_operand.vmem [shape: bf16[128,128], index: 1, kind: input, shape index: {}]   ;;  %s6771_s2 = inlined_call_operand.vmem [shape: f32[1,128], index: 2, kind: input, shape index: {}]   ;;  %s6772_s3 = inlined_call_operand.hbm [shape: bf16[128,512], index: 3, kind: input, shape index: {}]   ;;  %s6773_s4 = inlined_call_operand.hbm [shape: f32[1,512], index: 4, kind: input, shape index: {}]   ;;  %s6774_s5 = inlined_call_operand.hbm [shape: bf16[512,512], index: 5, kind: input, shape index: {}]   ;;  %s6775_s6 = inlined_call_operand.hbm [shape: f32[1,512], index: 6, kind: input, shape index: {}]   ;;  %s6776_s7 = inlined_call_operand.hbm [shape: bf16[512,512], index: 7, kind: input, shape index: {}]   ;;  %s6777_s8 = inlined_call_operand.vmem [shape: f32[1,512], index: 8, kind: input, shape index: {}]   ;;  %s6778_s9 = inlined_call_operand.hbm [shape: bf16[512,512], index: 9, kind: input, shape index: {}]   ;;  %s6779_s10 = inlined_call_operand.vmem [shape: f32[1,512], index: 10, kind: input, shape index: {}]   ;;  %s6780_s11 = inlined_call_operand.hbm [shape: bf16[512,128], index: 11, kind: input, shape index: {}]   ;;  %s6781_s12 = inlined_call_operand.vmem [shape: f32[1,128], index: 12, kind: input, shape index: {}]   ;;  %s6782_s13 = inlined_call_operand.vmem [shape: bf16[128,128], index: 13, kind: input, shape index: {}]   ;;  %s6783_s14 = inlined_call_operand.vmem [shape: f32[1,128], index: 14, kind: input, shape index: {}]   ;;  %s6784_s15 = inlined_call_operand.hbm [shape: f32[32,128], index: 15, kind: output, shape index: {}]  }
   0x1   :  { %6798 = sst [smem:[#allocation28_spill]] %s6773_s4 }
   0x2   :  { %6799 = sst [smem:[#allocation29_spill]] %s6775_s6 }
   0x3   :  { %6800 = sst [smem:[#allocation30_spill]] %s6781_s12 }
   0x4   :  { %6801 = sst [smem:[#allocation31_spill]] %s6783_s14 }
   0x5   :  { %6802 = sst [smem:[#allocation32_spill]] %s6784_s15 }
   0x6   :  { %20 = vsyncpa [#allocation3], 0 }
   0x7   :  { %21 = vsyncpa [#allocation6], 0 }
   0x8   :  { %22 = vsyncpa [#allocation9], 0 }
   0x9   :  { %23 = vsyncpa [#allocation12], 0 }
   0xa   :  { %24 = vsyncpa [#allocation4], 0 }
   0xb   :  { %26 = vsyncpa [#allocation4 + $0x1], 0  ;;  %s6363_s18 = smov 0   ;;  %s6365_s19 = smov 0  }
   0xc   :  { %s6367_s20 = smov 0   ;;  %s6369_s21 = smov 0  }
   0xd LB: > { %6803 = sst [smem:[#allocation20_spill]] %s6252_s18  ;;  %s6384_s22 = sadd.s32 4294967295, %s6264_s21   ;;  %s6264_s21 = sphi %s6369_s21, %s6837_s21   ;;  %s6260_s20 = sphi %s6367_s20, %s6840_s20   ;;  %s6256_s19 = sphi %s6365_s19, %s6839_s19   ;;  %s6252_s18 = sphi %s6363_s18, %s6838_s18  }
   0xe   : > { %6804 = sst [smem:[#allocation21_spill]] %s6256_s19  ;;  %s4555_s23 = sadd.s32 4294967294, %s6264_s21  }
   0xf   : > { %6805 = sst [smem:[#allocation22_spill]] %s6260_s20  ;;  %s6388_s24 = sadd.s32 1, %s6264_s21  }
  0x10   : > { %6806 = sst [smem:[#allocation23_spill]] %s6264_s21  ;;  %s359_s25 = sadd.s32 1, %s6260_s20 }
  0x11   : > { %6807 = sst [smem:[#allocation24_spill]] %s6388_s24  ;;  %s356_s26 = ssub.s32 %s6264_s21, %s6388_s24 }
  0x12   : > { %p369_p0 = scmp.ne.s32.totalorder %s6260_s20, %s6256_s19  ;;  %p357_p1 = scmp.eq.s32.totalorder %s356_s26, 0 }
  0x13   : > { %p370_p2 = scmp.eq.s32.totalorder %s6384_s22, 1  ;;  %p375_p3 = scmp.ne.s32.totalorder %s6256_s19, %s6252_s18 }
  0x14   : > { %p376_p4 = scmp.eq.s32.totalorder %s4555_s23, 1  ;;  %p4556_p7 = scmp.ge.s32.totalorder %s6264_s21, 1 }
  0x15   : > { %s6399_s27 = scalar_select %p357_p1, %s6260_s20, %s359_s25  }
  0x16   : > { %p6401_p5 = por %p370_p2, %p369_p0  ;;  %p6405_p6 = por %p376_p4, %p375_p3 }
  0x17   : > { %6808 = sst [smem:[#allocation25_spill]] %s6399_s27  ;;  %p383_p8 = scmp.lt.s32.totalorder %s6264_s21, 3 }
  0x18   : > { %s6809_s28 = scalar_select %p6401_p5, 1, 0 }
  0x19   : > { %s6811_s29 = scalar_select %p6405_p6, 1, 0 }
  0x1a   : > { %6810 = sst [smem:[#allocation26_spill]] %s6809_s28  ;;  %p6792_p9 = scmp.eq.s32.totalorder %s6384_s22, 0 }
  0x1b   : > { %6812 = sst [smem:[#allocation27_spill]] %s6811_s29  ;;  %p6412_p10 = pnand %p4556_p7, %p383_p8 }
  0x1c   : > { %s6266_s16 = smov [#allocation5]   ;;  %s6267_s23 = smov [#allocation8]  }
  0x1d   : > { %s6813_s30 = scalar_select %p6412_p10, 1, 0 }
  0x1e   : > { %s415_s17 = sshll.u32 %s6266_s16, 4  ;;  %p5229_p11 = pneg %p6412_p10  ;;  %s416_s17 = int_to_ptr.vmem [resolvable:$true] %s415_s17 }
  0x1f   : > { %s439_s25 = sshll.u32 %s6267_s23, 4  ;;  %s6268_s27 = smov [#allocation11]   ;;  %s6424_s25 = int_to_ptr.vmem [resolvable:$true] %s439_s25 }
  0x20   : > { %p6420_p12 = pnand %p6792_p9, %p5229_p11  ;;  %s6426_s20 = sshll.u32 %s6268_s27, 4  ;;  %s466_s20 = int_to_ptr.vmem [resolvable:$true] %s6426_s20 }
  0x21   : > { %s6815_s4 = sld [smem:[#allocation28_spill]] }
  0x22   : > { %p6436_p0 = pneg %p6420_p12 }
  0x27   : > { %s5990_s16 = scalar_lea.hbm %s6815_s4, 64 }
  0x28   : > { %p5991_p13 = scmp.ne.s32.totalorder %s6815_s4, %s5990_s16  ;;  %p5997_p3 = scmp.lt.u32.totalorder %s5990_s16, %s6815_s4 }
  0x2a   : > { %p5993_p1 = pnand %p6436_p0, %p5991_p13 }
  0x2c   : > { %p5994_p2 = pneg %p5993_p1 }
  0x2e   : > { %p5999_p4 = pnand %p5997_p3, %p5994_p2 }
  0x30   : > { %6002 = shalt.err (!%p5999_p4)
}
  0x31   : > { %s6003_s24 = scalar_lea.vmem %s416_s17, 64  ;;  %p6011_p9 = scmp.lt.s32.totalorder %s416_s17, %s416_s17 }
  0x32   : > { %p6004_p7 = scmp.ne.s32.totalorder %s416_s17, %s6003_s24  ;;  %p6012_p6 = scmp.lt.s32.totalorder %s6003_s24, %s6003_s24 }
  0x34   : > { %p6006_p8 = pnand %p6004_p7, %p6436_p0  ;;  %p6013_p5 = por %p6012_p6, %p6011_p9 }
  0x36   : > { %p6007_p11 = pneg %p6006_p8 }
  0x38   : > { %p6014_p10 = pnand %p6013_p5, %p6007_p11 }
  0x3a   : > { %6017 = shalt.err (!%p6014_p10)
}
  0x3b   : > { %5235 = dma.hbm_to_vmem [thread:$0]  (!%p6420_p12), %s6815_s4, 64, %s416_s17, [#allocation6]  }
  0x3c   : > { %s6817_s6 = sld [smem:[#allocation29_spill]] }
  0x42   : > { %s6018_s16 = scalar_lea.hbm %s6817_s6, 64 }
  0x43   : > { %p6019_p13 = scmp.ne.s32.totalorder %s6817_s6, %s6018_s16  ;;  %p6025_p5 = scmp.lt.u32.totalorder %s6018_s16, %s6817_s6 }
  0x45   : > { %p6021_p1 = pnand %p6019_p13, %p6436_p0 }
  0x47   : > { %p6022_p6 = pneg %p6021_p1 }
  0x49   : > { %p6027_p9 = pnand %p6025_p5, %p6022_p6 }
  0x4b   : > { %6030 = shalt.err (!%p6027_p9)
}
  0x4c   : > { %s6031_s17 = scalar_lea.vmem %s6424_s25, 64  ;;  %p6039_p4 = scmp.lt.s32.totalorder %s6424_s25, %s6424_s25 }
  0x4d   : > { %p6032_p10 = scmp.ne.s32.totalorder %s6424_s25, %s6031_s17  ;;  %p6040_p7 = scmp.lt.s32.totalorder %s6031_s17, %s6031_s17 }
  0x4f   : > { %p6034_p2 = pnand %p6032_p10, %p6436_p0  ;;  %p6041_p8 = por %p6040_p7, %p6039_p4 }
  0x51   : > { %p6035_p3 = pneg %p6034_p2 }
  0x53   : > { %p6042_p11 = pnand %p6041_p8, %p6035_p3 }
  0x55   : > { %6045 = shalt.err (!%p6042_p11)
}
  0x56   : > { %5241 = dma.hbm_to_vmem [thread:$0]  (!%p6420_p12), %s6817_s6, 64, %s6424_s25, [#allocation9]  }
  0x57   : > { %s6046_s15 = scalar_lea.hbm %s6778_s9, 16384 }
  0x58   : > { %p6047_p13 = scmp.ne.s32.totalorder %s6778_s9, %s6046_s15  ;;  %p6053_p5 = scmp.lt.u32.totalorder %s6046_s15, %s6778_s9 }
  0x5a   : > { %p6049_p1 = pnand %p6047_p13, %p6436_p0 }
  0x5c   : > { %p6050_p6 = pneg %p6049_p1 }
  0x5e   : > { %p6055_p9 = pnand %p6053_p5, %p6050_p6 }
  0x60   : > { %6058 = shalt.err (!%p6055_p9)
}
  0x61   : > { %s6059_s17 = scalar_lea.vmem %s466_s20, 16384  ;;  %p6067_p4 = scmp.lt.s32.totalorder %s466_s20, %s466_s20 }
  0x62   : > { %p6060_p10 = scmp.ne.s32.totalorder %s466_s20, %s6059_s17  ;;  %p6068_p7 = scmp.lt.s32.totalorder %s6059_s17, %s6059_s17 }
  0x64   : > { %p6062_p2 = pnand %p6060_p10, %p6436_p0  ;;  %p6069_p8 = por %p6068_p7, %p6067_p4 }
  0x66   : > { %p6063_p3 = pneg %p6062_p2 }
  0x68   : > { %p6070_p11 = pnand %p6069_p8, %p6063_p3 }
  0x6a   : > { %6073 = shalt.err (!%p6070_p11)
}
  0x6b   : > { %s6269_s25 = smov 256   ;;  %s6270_s14 = smov 16  }
  0x6c   : > { %5247 = dma.hbm_to_vmem [thread:$0]  (!%p6420_p12), %s6778_s9, 16384, %s466_s20, [#allocation12], %s6269_s25, %s6269_s25, %s6270_s14  }
  0x6d   : > { %s6271_s21 = smov [#allocation2]   ;;  %s6272_s29 = smov [#allocation7]  }
  0x6e   : > { %s401_s15 = sshll.u32 %s6271_s21, 4  ;;  %s425_s16 = sshll.u32 %s6272_s29, 4  ;;  %s402_s15 = int_to_ptr.vmem [resolvable:$true] %s401_s15  ;;  %s426_s16 = int_to_ptr.vmem [resolvable:$true] %s425_s16 }
  0x6f   : > { %s6074_s17 = scalar_lea.hbm %s6772_s3, 4096 }
  0x70   : > { %p6075_p13 = scmp.ne.s32.totalorder %s6772_s3, %s6074_s17  ;;  %p6081_p5 = scmp.lt.u32.totalorder %s6074_s17, %s6772_s3 }
  0x72   : > { %p6077_p1 = pnand %p6075_p13, %p6436_p0 }
  0x74   : > { %p6078_p6 = pneg %p6077_p1 }
  0x76   : > { %p6083_p9 = pnand %p6081_p5, %p6078_p6 }
  0x78   : > { %6086 = shalt.err (!%p6083_p9)
}
  0x79   : > { %s6087_s20 = scalar_lea.vmem %s402_s15, 4096  ;;  %p6095_p4 = scmp.lt.s32.totalorder %s402_s15, %s402_s15 }
  0x7a   : > { %p6088_p10 = scmp.ne.s32.totalorder %s402_s15, %s6087_s20  ;;  %p6096_p7 = scmp.lt.s32.totalorder %s6087_s20, %s6087_s20 }
  0x7c   : > { %p6090_p2 = pnand %p6088_p10, %p6436_p0  ;;  %p6097_p8 = por %p6096_p7, %p6095_p4 }
  0x7e   : > { %p6091_p3 = pneg %p6090_p2 }
  0x80   : > { %p6098_p11 = pnand %p6097_p8, %p6091_p3 }
  0x82   : > { %6101 = shalt.err (!%p6098_p11)
}
  0x83   : > { %5232 = dma.hbm_to_vmem [thread:$0]  (!%p6420_p12), %s6772_s3, 4096, %s402_s15, [#allocation3], %s6269_s25, %s6269_s25, %s6270_s14  }
  0x84   : > { %s6102_s28 = scalar_lea.hbm %s6774_s5, 16384 }
  0x85   : > { %p6103_p13 = scmp.ne.s32.totalorder %s6774_s5, %s6102_s28  ;;  %p6109_p5 = scmp.lt.u32.totalorder %s6102_s28, %s6774_s5 }
  0x87   : > { %p6105_p1 = pnand %p6103_p13, %p6436_p0 }
  0x89   : > { %p6106_p6 = pneg %p6105_p1 }
  0x8b   : > { %p6111_p9 = pnand %p6109_p5, %p6106_p6 }
  0x8d   : > { %6114 = shalt.err (!%p6111_p9)
}
  0x8e   : > { %s6115_s24 = scalar_lea.vmem %s426_s16, 16384  ;;  %p6123_p4 = scmp.lt.s32.totalorder %s426_s16, %s426_s16 }
  0x8f   : > { %p6116_p10 = scmp.ne.s32.totalorder %s426_s16, %s6115_s24  ;;  %p6124_p7 = scmp.lt.s32.totalorder %s6115_s24, %s6115_s24 }
  0x91   : > { %p6118_p2 = pnand %p6116_p10, %p6436_p0  ;;  %p6125_p8 = por %p6124_p7, %p6123_p4 }
  0x93   : > { %p6119_p3 = pneg %p6118_p2 }
  0x95   : > { %p6126_p11 = pnand %p6125_p8, %p6119_p3 }
  0x97   : > { %6129 = shalt.err (!%p6126_p11)
}
  0x98   : > { %5238 = dma.hbm_to_vmem [thread:$0]  (!%p6420_p12), %s6774_s5, 16384, %s426_s16, [#allocation6], %s6269_s25, %s6269_s25, %s6270_s14  }
  0x99   : > { %s6273_s20 = smov [#allocation10]   ;;  %s6274_s6 = smov [#allocation13]  }
  0x9a   : > { %s449_s4 = sshll.u32 %s6273_s20, 4  ;;  %s481_s12 = sshll.u32 %s6274_s6, 4  ;;  %s450_s4 = int_to_ptr.vmem [resolvable:$true] %s449_s4  ;;  %s482_s12 = int_to_ptr.vmem [resolvable:$true] %s481_s12 }
  0x9b   : > { %s6130_s18 = scalar_lea.hbm %s6776_s7, 16384 }
  0x9c   : > { %p6131_p13 = scmp.ne.s32.totalorder %s6776_s7, %s6130_s18  ;;  %p6137_p5 = scmp.lt.u32.totalorder %s6130_s18, %s6776_s7 }
  0x9e   : > { %p6133_p1 = pnand %p6131_p13, %p6436_p0 }
  0xa0   : > { %p6134_p6 = pneg %p6133_p1 }
  0xa2   : > { %p6139_p9 = pnand %p6137_p5, %p6134_p6 }
  0xa4   : > { %6142 = shalt.err (!%p6139_p9)
}
  0xa5   : > { %s6143_s16 = scalar_lea.vmem %s450_s4, 16384  ;;  %p6151_p4 = scmp.lt.s32.totalorder %s450_s4, %s450_s4 }
  0xa6   : > { %p6144_p10 = scmp.ne.s32.totalorder %s450_s4, %s6143_s16  ;;  %p6152_p7 = scmp.lt.s32.totalorder %s6143_s16, %s6143_s16 }
  0xa8   : > { %p6146_p2 = pnand %p6144_p10, %p6436_p0  ;;  %p6153_p8 = por %p6152_p7, %p6151_p4 }
  0xaa   : > { %p6147_p3 = pneg %p6146_p2 }
  0xac   : > { %p6154_p11 = pnand %p6153_p8, %p6147_p3 }
  0xae   : > { %6157 = shalt.err (!%p6154_p11)
}
  0xaf   : > { %5244 = dma.hbm_to_vmem [thread:$0]  (!%p6420_p12), %s6776_s7, 16384, %s450_s4, [#allocation9], %s6269_s25, %s6269_s25, %s6270_s14  }
  0xb0   : > { %s6158_s19 = scalar_lea.hbm %s6780_s11, 4096 }
  0xb1   : > { %p6159_p13 = scmp.ne.s32.totalorder %s6780_s11, %s6158_s19  ;;  %p6165_p5 = scmp.lt.u32.totalorder %s6158_s19, %s6780_s11 }
  0xb3   : > { %p6161_p1 = pnand %p6159_p13, %p6436_p0 }
  0xb5   : > { %p6162_p6 = pneg %p6161_p1 }
  0xb7   : > { %p6167_p9 = pnand %p6165_p5, %p6162_p6 }
  0xb9   : > { %6170 = shalt.err (!%p6167_p9)
}
  0xba   : > { %s6171_s27 = scalar_lea.vmem %s482_s12, 4096  ;;  %p6179_p4 = scmp.lt.s32.totalorder %s482_s12, %s482_s12 }
  0xbb   : > { %p6172_p10 = scmp.ne.s32.totalorder %s482_s12, %s6171_s27  ;;  %p6180_p7 = scmp.lt.s32.totalorder %s6171_s27, %s6171_s27 }
  0xbd   : > { %p6174_p2 = pnand %p6172_p10, %p6436_p0  ;;  %p6181_p8 = por %p6180_p7, %p6179_p4 }
  0xbf   : > { %p6175_p3 = pneg %p6174_p2 }
  0xc1   : > { %p6182_p11 = pnand %p6181_p8, %p6175_p3 }
  0xc3   : > { %6185 = shalt.err (!%p6182_p11)
}
  0xc4   : > { %s6275_s25 = smov 64   ;;  %s6276_s14 = smov 4  }
  0xc5   : > { %5250 = dma.hbm_to_vmem [thread:$0]  (!%p6420_p12), %s6780_s11, 4096, %s482_s12, [#allocation12], %s6275_s25, %s6275_s25, %s6276_s14  }
  0xc6   : > { %p6818_p13 = scmp.ne.s32.totalorder %s6813_s30, 0 }
  0xc7   : > { %p6819_p1 = scmp.eq.s32.totalorder (!%p6818_p13), %s6384_s22, 0 }
  0xc8   : > { %515 = sbr.rel (%p6818_p13) target bundleno = 2019 (0x7e3), region = 80 }
  0xcf   : > { %6231 = dma.done.wait (%p6819_p1), [#allocation3], 4096   ;;  %p6820_p0 = pmov %p6819_p1 }
  0xd1   : > { %6233 = vsyncadd (%p6820_p0), [#allocation3], 4294963200  ;;  %p6821_p6 = pmov %p6820_p0 }
  0xd2   : > { %p6822_p5 = pmov %p6820_p0 }
  0xd3   : > { %6235 = dma.done.wait (%p6821_p6), [#allocation6], 16448  }
  0xd4   : > { %6237 = vsyncadd (%p6822_p5), [#allocation6], 4294950848  ;;  %p6823_p9 = pmov %p6820_p0 }
  0xd5   : > { %p6824_p12 = pmov %p6820_p0 }
  0xd6   : > { %6239 = dma.done.wait (%p6823_p9), [#allocation9], 16448  }
  0xd7   : > { %6241 = vsyncadd (%p6824_p12), [#allocation9], 4294950848  ;;  %p6825_p10 = pmov %p6820_p0 }
  0xd8   : > { %p6826_p2 = pmov %p6820_p0 }
  0xd9   : > { %6243 = dma.done.wait (%p6825_p10), [#allocation12], 20480  }
  0xda   : > { %6245 = vsyncadd (%p6826_p2), [#allocation12], 4294946816  ;;  %v6277_v0 = vmov 0.0   ;;  %vm6278_vm0 = vmmov 0   ;;  %v5318_v1 = vld [vmem:[%s6770_s1] sm:$0xff]   ;;  %v5319_v2 = vld [vmem:[%s6770_s1 + $0x8] sm:$0xff]  }
  0xdb   : > { %5111 = vmatprep.subr.bf16.mxu0 %v6277_v0  ;;  %5127 = vmatprep.mubr.msk.bf16.mxu0 %vm6278_vm0, %v6277_v0  ;;  %v5320_v3 = vld [vmem:[%s6770_s1 + $0x10] sm:$0xff]   ;;  %s4574_s17 = sshll.u32 %s6384_s22, 1  ;;  %v5321_v5 = vld [vmem:[%s6770_s1 + $0x18] sm:$0xff]   ;;  %v5322_v8 = vld [vmem:[%s6770_s1 + $0x20] sm:$0xff]   ;;  %v6279_v44 = vmov 0   ;;  %s6827_s20 = sld [smem:[#allocation30_spill]] }
  0xdc   : > { %5112 = vmatpush3.bf16.msra.mxu0 %v5318_v1  ;;  %v5326_v4 = vld [vmem:[#allocation2 + $0x4] ss:$16 sps:$4 sm:$0xff]   ;;  %p588_p3 = scmp.lt.s32.totalorder %s4574_s17, 3  ;;  %v5331_v6 = vld [vmem:[#allocation2] ss:$16 sps:$4 sm:$0xff]   ;;  %v5323_v12 = vld [vmem:[%s6770_s1 + $0x28] sm:$0xff]   ;;  %960 = vmatprep.mubr.bf16.mxu1 %v6279_v44 }
  0xdd   : > { %5113 = vmatprep.subr.bf16.mxu0 %v6277_v0  ;;  %928 = vmatprep.subr.bf16.mxu1 %v5326_v4  ;;  %v5332_v7 = vld [vmem:[#allocation2 + $0x24] ss:$16 sps:$4 sm:$0xff]   ;;  %v5337_v9 = vld [vmem:[#allocation2 + $0x20] ss:$16 sps:$4 sm:$0xff]   ;;  %v5325_v17 = vld [vmem:[%s6770_s1 + $0x38] sm:$0xff]   ;;  %s6828_s6 = sld [smem:[#allocation21_spill]] }
  0xde   : > { %929 = vmatpush1.bf16.msra.mxu1 %v5331_v6  ;;  %s6842_s17 = smov (!%p588_p3, %s4574_s17), 3  ;;  %v5338_v10 = vld [vmem:[#allocation2 + $0x44] ss:$16 sps:$4 sm:$0xff]   ;;  %v5343_v11 = vld [vmem:[#allocation2 + $0x40] ss:$16 sps:$4 sm:$0xff]   ;;  %s6830_s25 = sld [smem:[#allocation26_spill]] }
  0xdf   : > { %930 = vmatprep.subr.bf16.mxu1 %v5332_v7  ;;  %s4575_s29 = sshll.u32 %s6842_s17, 3  ;;  %v5344_v13 = vld [vmem:[#allocation2 + $0x64] ss:$16 sps:$4 sm:$0xff]   ;;  %v5349_v15 = vld [vmem:[#allocation2 + $0x60] ss:$16 sps:$4 sm:$0xff]   ;;  %s5048_s4 = sshll.u32 %s6384_s22, 8 }
  0xe0   : > { %5114 = vmatpush3.bf16.msra.mxu0 %v5319_v2  ;;  %v5324_v14 = vld [vmem:[%s6770_s1 + $0x30] sm:$0xff]   ;;  %s591_s24 = scalar_lea.vmem %s6769_s0, %s4575_s29  ;;  %v5330_v22 = vld [vmem:[#allocation2 + $0xc] ss:$16 sps:$4 sm:$0xff]   ;;  %v5328_v23 = vld [vmem:[#allocation2 + $0x8] ss:$16 sps:$4 sm:$0xff]   ;;  %s6829_s29 = sld [smem:[#allocation31_spill]] }
  0xe1   : > { %5115 = vmatprep.subr.bf16.mxu0 %v6277_v0  ;;  %v5350_v16 = vld [vmem:[#allocation2 + $0x84] ss:$16 sps:$4 sm:$0xff]   ;;  %v597_v19 = vld [vmem:[%s591_s24 + $0x8] sm:$0xff]  ;;  %v5355_v20 = vld [vmem:[#allocation2 + $0x80] ss:$16 sps:$4 sm:$0xff]   ;;  %s6831_s26 = sld [smem:[#allocation32_spill]] }
  0xe2   : > { %931 = vmatpush1.bf16.msra.mxu1 %v5337_v9  ;;  %v596_v18 = vld [vmem:[%s591_s24] sm:$0xff]  ;;  %v5336_v25 = vld [vmem:[#allocation2 + $0x2c] ss:$16 sps:$4 sm:$0xff]   ;;  %v5334_v26 = vld [vmem:[#allocation2 + $0x28] ss:$16 sps:$4 sm:$0xff]   ;;  %s6280_s16 = smov [#allocation14]  }
  0xe3   : > { %932 = vmatprep.subr.bf16.mxu1 %v5338_v10  ;;  %v5356_v21 = vld [vmem:[#allocation2 + $0xa4] ss:$16 sps:$4 sm:$0xff]   ;;  %v598_v24 = vpack.c.bf16 %v597_v19, %v596_v18  ;;  %v5342_v27 = vld [vmem:[#allocation2 + $0x4c] ss:$16 sps:$4 sm:$0xff]   ;;  %v5340_v28 = vld [vmem:[#allocation2 + $0x48] ss:$16 sps:$4 sm:$0xff]  }
  0xe4   : > { %5116 = vmatpush3.bf16.msra.mxu0 %v5320_v3  ;;  %v5348_v29 = vld [vmem:[#allocation2 + $0x6c] ss:$16 sps:$4 sm:$0xff]   ;;  %v5346_v30 = vld [vmem:[#allocation2 + $0x68] ss:$16 sps:$4 sm:$0xff]   ;;  %v5361_v35 = vld [vmem:[#allocation2 + $0xa0] ss:$16 sps:$4 sm:$0xff]  }
  0xe5   : > { %5117 = vmatprep.subr.bf16.mxu0 %v6277_v0  ;;  %v5354_v31 = vld [vmem:[#allocation2 + $0x8c] ss:$16 sps:$4 sm:$0xff]   ;;  %v5352_v32 = vld [vmem:[#allocation2 + $0x88] ss:$16 sps:$4 sm:$0xff]   ;;  %v5362_v36 = vld [vmem:[#allocation2 + $0xc4] ss:$16 sps:$4 sm:$0xff]  }
  0xe6   : > { %933 = vmatpush1.bf16.msra.mxu1 %v5343_v11  ;;  %v5360_v33 = vld [vmem:[#allocation2 + $0xac] ss:$16 sps:$4 sm:$0xff]   ;;  %v5358_v34 = vld [vmem:[#allocation2 + $0xa8] ss:$16 sps:$4 sm:$0xff]   ;;  %v5367_v39 = vld [vmem:[#allocation2 + $0xc0] ss:$16 sps:$4 sm:$0xff]  }
  0xe7   : > { %934 = vmatprep.subr.bf16.mxu1 %v5344_v13  ;;  %v5366_v37 = vld [vmem:[#allocation2 + $0xcc] ss:$16 sps:$4 sm:$0xff]   ;;  %v5364_v38 = vld [vmem:[#allocation2 + $0xc8] ss:$16 sps:$4 sm:$0xff]   ;;  %v5368_v40 = vld [vmem:[#allocation2 + $0xe4] ss:$16 sps:$4 sm:$0xff]   ;;  %s6726_s23 = scalar_lea.hbm %s6831_s26, %s5048_s4 }
  0xe8   : > { %5118 = vmatpush3.bf16.msra.mxu0 %v5321_v5  ;;  %v5372_v41 = vld [vmem:[#allocation2 + $0xec] ss:$16 sps:$4 sm:$0xff]   ;;  %v5370_v42 = vld [vmem:[#allocation2 + $0xe8] ss:$16 sps:$4 sm:$0xff]   ;;  %v5373_v43 = vld [vmem:[#allocation2 + $0xe0] ss:$16 sps:$4 sm:$0xff]  }
  0xe9   : > { %5119 = vmatprep.subr.bf16.mxu0 %v6277_v0  ;;  %v5376_v45 = vld [vmem:[#allocation7 + $0x4] ss:$16 sps:$4 sm:$0xff]   ;;  %v5379_v46 = vld [vmem:[#allocation7 + $0xc] ss:$16 sps:$4 sm:$0xff]   ;;  %v5374_v56 = vld [vmem:[#allocation7] ss:$16 sps:$4 sm:$0xff]  }
  0xea   : > { %935 = vmatpush1.bf16.msra.mxu1 %v5349_v15  ;;  %v4576_v47 = vld [vmem:[%s6771_s2] ss:$0 sm:$0xff]  ;;  %v5377_v57 = vld [vmem:[#allocation7 + $0x8] ss:$16 sps:$4 sm:$0xff]   ;;  %v5382_v59 = vld [vmem:[#allocation7 + $0x24] ss:$16 sps:$4 sm:$0xff]  }
  0xeb   : > { %936 = vmatprep.subr.bf16.mxu1 %v5350_v16  ;;  %v5385_v60 = vld [vmem:[#allocation7 + $0x2c] ss:$16 sps:$4 sm:$0xff]   ;;  %v5380_v61 = vld [vmem:[#allocation7 + $0x20] ss:$16 sps:$4 sm:$0xff]   ;;  %v5383_v62 = vld [vmem:[#allocation7 + $0x28] ss:$16 sps:$4 sm:$0xff]  }
  0xec   : > { %5120 = vmatpush3.bf16.msra.mxu0 %v5322_v8  ;;  %v5388_v63 = vld [vmem:[#allocation7 + $0x44] ss:$16 sps:$4 sm:$0xff]   ;;  %v5391_v1 = vld [vmem:[#allocation7 + $0x4c] ss:$16 sps:$4 sm:$0xff]   ;;  %v5386_v2 = vld [vmem:[#allocation7 + $0x40] ss:$16 sps:$4 sm:$0xff]  }
  0xed   : > { %5121 = vmatprep.subr.bf16.mxu0 %v6277_v0  ;;  %v5389_v3 = vld [vmem:[#allocation7 + $0x48] ss:$16 sps:$4 sm:$0xff]   ;;  %v5394_v4 = vld [vmem:[#allocation7 + $0x64] ss:$16 sps:$4 sm:$0xff]   ;;  %v5397_v5 = vld [vmem:[#allocation7 + $0x6c] ss:$16 sps:$4 sm:$0xff]  }
  0xee   : > { %937 = vmatpush1.bf16.msra.mxu1 %v5355_v20  ;;  %v5392_v6 = vld [vmem:[#allocation7 + $0x60] ss:$16 sps:$4 sm:$0xff]   ;;  %v5395_v7 = vld [vmem:[#allocation7 + $0x68] ss:$16 sps:$4 sm:$0xff]   ;;  %v5400_v8 = vld [vmem:[#allocation7 + $0x84] ss:$16 sps:$4 sm:$0xff]  }
  0xef   : > { %938 = vmatprep.subr.bf16.mxu1 %v5356_v21  ;;  %v5403_v9 = vld [vmem:[#allocation7 + $0x8c] ss:$16 sps:$4 sm:$0xff]   ;;  %v5398_v10 = vld [vmem:[#allocation7 + $0x80] ss:$16 sps:$4 sm:$0xff]   ;;  %v5401_v11 = vld [vmem:[#allocation7 + $0x88] ss:$16 sps:$4 sm:$0xff]  }
  0xf0   : > { %5122 = vmatpush3.bf16.msra.mxu0 %v5323_v12  ;;  %v5406_v12 = vld [vmem:[#allocation7 + $0xa4] ss:$16 sps:$4 sm:$0xff]   ;;  %v5409_v13 = vld [vmem:[#allocation7 + $0xac] ss:$16 sps:$4 sm:$0xff]   ;;  %v5407_v15 = vld [vmem:[#allocation7 + $0xa8] ss:$16 sps:$4 sm:$0xff]  }
  0xf1   : > { %5123 = vmatprep.subr.bf16.mxu0 %v6277_v0  ;;  %v5412_v16 = vld [vmem:[#allocation7 + $0xc4] ss:$16 sps:$4 sm:$0xff]   ;;  %v5410_v18 = vld [vmem:[#allocation7 + $0xc0] ss:$16 sps:$4 sm:$0xff]   ;;  %v5413_v19 = vld [vmem:[#allocation7 + $0xc8] ss:$16 sps:$4 sm:$0xff]  }
  0xf2   : > { %939 = vmatpush1.bf16.msra.mxu1 %v5361_v35  ;;  %v5418_v20 = vld [vmem:[#allocation7 + $0xe4] ss:$16 sps:$4 sm:$0xff]   ;;  %v5421_v21 = vld [vmem:[#allocation7 + $0xec] ss:$16 sps:$4 sm:$0xff]   ;;  %v5437_v35 = vld [vmem:[#allocation7 + $0x148] ss:$16 sps:$4 sm:$0xff]  }
  0xf3   : > { %940 = vmatprep.subr.bf16.mxu1 %v5362_v36  ;;  %v5442_v36 = vld [vmem:[#allocation7 + $0x164] ss:$16 sps:$4 sm:$0xff]   ;;  %s584_s19 = sand.u32 1, %s6828_s6   ;;  %p6832_p7 = scmp.ne.s32.totalorder %s6830_s25, 0 }
  0xf4   : > { %5124 = vmatpush3.bf16.msra.mxu0 %v5324_v14  ;;  %v5404_v14 = vld [vmem:[#allocation7 + $0xa0] ss:$16 sps:$4 sm:$0xff]   ;;  %s4573_s28 = sshll.u32 %s584_s19, 4  ;;  %s6728_s12 = scalar_lea.sflag [#allocation4], %s584_s19 }
  0xf5   : > { %5125 = vmatprep.subr.bf16.mxu0 %v6277_v0  ;;  %s586_s27 = scalar_lea.vmem [#allocation14], %s4573_s28  ;;  %s6190_s15 = sshll.u32 %s6280_s16, 4  ;;  %s6191_s15 = int_to_ptr.vmem [resolvable:$false] %s6190_s15 }
  0xf6   : > { %941 = vmatpush1.bf16.msra.mxu1 %v5367_v39  ;;  %v5443_v39 = vld [vmem:[#allocation7 + $0x168] ss:$16 sps:$4 sm:$0xff]   ;;  %s4424_s14 = sshll.u32 %s586_s27, 4  ;;  %s6192_s17 = scalar_lea.vmem %s6191_s15, 512  ;;  %s6721_s14 = int_to_ptr.vmem [resolvable:$true] %s4424_s14 }
  0xf7   : > { %942 = vmatprep.subr.bf16.mxu1 %v5368_v40  ;;  %v5448_v40 = vld [vmem:[#allocation7 + $0x184] ss:$16 sps:$4 sm:$0xff]   ;;  %s6186_s22 = scalar_lea.vmem %s6721_s14, 256  ;;  %p6193_p13 = scmp.lt.s32.totalorder %s6721_s14, %s6191_s15 }
  0xf8   : > { %5126 = vmatpush3.bf16.msra.mxu0 %v5325_v17  ;;  %v5415_v17 = vld [vmem:[#allocation7 + $0xcc] ss:$16 sps:$4 sm:$0xff]   ;;  %p6187_p4 = scmp.ne.s32.totalorder %s6721_s14, %s6186_s22  ;;  %p6194_p1 = scmp.lt.s32.totalorder %s6192_s17, %s6186_s22 }
  0xf9   : > { %971 = vmatprep.subr.bf16.mxu0 %v5330_v22  ;;  %v5416_v22 = vld [vmem:[#allocation7 + $0xe0] ss:$16 sps:$4 sm:$0xff]  }
  0xfa   : > { %943 = vmatpush1.bf16.msra.mxu1 %v5373_v43  ;;  %v5449_v43 = vld [vmem:[#allocation7 + $0x188] ss:$16 sps:$4 sm:$0xff]   ;;  %p6188_p8 = pnand %p6187_p4, %p6832_p7  ;;  %p6195_p0 = por %p6194_p1, %p6193_p13 }
  0xfb   : > { %5128 = vmatmul.mubr.bf16.vlgmr.msra.gmra.mrb[0].mxu0 %v598_v24  ;;  %1816 = vmatprep.subr.bf16.mxu1 %v5376_v45  ;;  %v5424_v24 = vld [vmem:[#allocation7 + $0x104] ss:$16 sps:$4 sm:$0xff]   ;;  %v5457_v45 = vld [vmem:[#allocation7 + $0x1ac] ss:$16 sps:$4 sm:$0xff]  }
  0xfc   : > { %972 = vmatpush1.bf16.msra.mxu0 %v5328_v23  ;;  %1003 = vmatprep.mubr.bf16.mxu0 %v6279_v44  ;;  %v5419_v23 = vld [vmem:[#allocation7 + $0xe8] ss:$16 sps:$4 sm:$0xff]   ;;  %v5454_v44 = vld [vmem:[#allocation7 + $0x1a4] ss:$16 sps:$4 sm:$0xff]   ;;  %p6189_p11 = pneg %p6188_p8 }
  0xfd   : > { %973 = vmatprep.subr.bf16.mxu0 %v5336_v25  ;;  %v5427_v25 = vld [vmem:[#allocation7 + $0x10c] ss:$16 sps:$4 sm:$0xff]  }
  0xfe   : > { %p6196_p6 = pnand %p6195_p0, %p6189_p11 }
 0x100   : > { %974 = vmatpush1.bf16.msra.mxu0 %v5334_v26  ;;  %v5422_v26 = vld [vmem:[#allocation7 + $0x100] ss:$16 sps:$4 sm:$0xff]  }
 0x101   : > { %975 = vmatprep.subr.bf16.mxu0 %v5342_v27  ;;  %v5425_v27 = vld [vmem:[#allocation7 + $0x108] ss:$16 sps:$4 sm:$0xff]  }
 0x104   : > { %976 = vmatpush1.bf16.msra.mxu0 %v5340_v28  ;;  %v5430_v28 = vld [vmem:[#allocation7 + $0x124] ss:$16 sps:$4 sm:$0xff]  }
 0x105   : > { %977 = vmatprep.subr.bf16.mxu0 %v5348_v29  ;;  %v5433_v29 = vld [vmem:[#allocation7 + $0x12c] ss:$16 sps:$4 sm:$0xff]  }
 0x108   : > { %978 = vmatpush1.bf16.msra.mxu0 %v5346_v30  ;;  %v5428_v30 = vld [vmem:[#allocation7 + $0x120] ss:$16 sps:$4 sm:$0xff]  }
 0x109   : > { %979 = vmatprep.subr.bf16.mxu0 %v5354_v31  ;;  %v5431_v31 = vld [vmem:[#allocation7 + $0x128] ss:$16 sps:$4 sm:$0xff]  }
 0x10c   : > { %980 = vmatpush1.bf16.msra.mxu0 %v5352_v32  ;;  %v5436_v32 = vld [vmem:[#allocation7 + $0x144] ss:$16 sps:$4 sm:$0xff]  }
 0x10d   : > { %981 = vmatprep.subr.bf16.mxu0 %v5360_v33  ;;  %v5439_v33 = vld [vmem:[#allocation7 + $0x14c] ss:$16 sps:$4 sm:$0xff]  }
 0x110   : > { %982 = vmatpush1.bf16.msra.mxu0 %v5358_v34  ;;  %v5434_v34 = vld [vmem:[#allocation7 + $0x140] ss:$16 sps:$4 sm:$0xff]  }
 0x111   : > { %983 = vmatprep.subr.bf16.mxu0 %v5366_v37  ;;  %v5445_v37 = vld [vmem:[#allocation7 + $0x16c] ss:$16 sps:$4 sm:$0xff]  }
 0x114   : > { %984 = vmatpush1.bf16.msra.mxu0 %v5364_v38  ;;  %v5440_v38 = vld [vmem:[#allocation7 + $0x160] ss:$16 sps:$4 sm:$0xff]  }
 0x115   : > { %985 = vmatprep.subr.bf16.mxu0 %v5372_v41  ;;  %v5451_v41 = vld [vmem:[#allocation7 + $0x18c] ss:$16 sps:$4 sm:$0xff]  }
 0x118   : > { %986 = vmatpush1.bf16.msra.mxu0 %v5370_v42  ;;  %v5446_v42 = vld [vmem:[#allocation7 + $0x180] ss:$16 sps:$4 sm:$0xff]  }
 0x119   : > { %1902 = vmatprep.subr.bf16.mxu0 %v5379_v46  ;;  %v5452_v46 = vld [vmem:[#allocation7 + $0x1a0] ss:$16 sps:$4 sm:$0xff]  }
 0x1ce   : > { %v704_v48 = vpop.f32.mrb[0].mxu0 }
 0x1cf   : > { %v5129_v49 = vpop.f32.mrb[1].mxu0  ;;  %v705_v51 = vadd.f32 %v4576_v47, %v704_v48  ;;  %v5460_v48 = vld [vmem:[#allocation7 + $0x1c4] ss:$16 sps:$4 sm:$0xff]  }
 0x1d0   : > { %v707_v50 = vpop.f32.mrb[2].mxu0  ;;  %v5463_v49 = vld [vmem:[#allocation7 + $0x1cc] ss:$16 sps:$4 sm:$0xff]  }
 0x1d1   : > { %v708_v52 = vadd.f32 %v4576_v47, %v707_v50  ;;  %v5130_v53 = vpop.f32.mrb[3].mxu0  ;;  %v5455_v47 = vld [vmem:[#allocation7 + $0x1a8] ss:$16 sps:$4 sm:$0xff]   ;;  %v5458_v50 = vld [vmem:[#allocation7 + $0x1c0] ss:$16 sps:$4 sm:$0xff]  }
 0x1d2   : > { %v5469_v53 = vld [vmem:[#allocation7 + $0x1ec] ss:$16 sps:$4 sm:$0xff]  }
 0x1d3   : > { %v711_v54 = vpack.c.bf16 %v708_v52, %v705_v51  ;;  %v5461_v51 = vld [vmem:[#allocation7 + $0x1c8] ss:$16 sps:$4 sm:$0xff]   ;;  %v5466_v52 = vld [vmem:[#allocation7 + $0x1e4] ss:$16 sps:$4 sm:$0xff]  }
 0x1d5   : > { %v712_v55 = vmul.bf16 1009007652, %v711_v54 }
 0x1d7   : > { %v713_v58 = vmax.bf16 %v712_v55, %v711_v54  ;;  %v5464_v54 = vld [vmem:[#allocation7 + $0x1e0] ss:$16 sps:$4 sm:$0xff]   ;;  %v5467_v55 = vld [vmem:[#allocation7 + $0x1e8] ss:$16 sps:$4 sm:$0xff]  }
 0x1d9   : > { %961 = vmatmul.mubr.bf16.vlgmr.msra.gmra.mrb[0].mxu1 %v713_v58  ;;  %1004 = vmatmul.mubr.bf16.vlgmr.msra.gmra.mrb[4].mxu0 %v713_v58  ;;  %v748_v58 = vlaneseq }
 0x1da   : > { %1817 = vmatpush1.bf16.msra.mxu1 %v5374_v56  ;;  %1903 = vmatpush1.bf16.msra.mxu0 %v5377_v57  ;;  %v5472_v56 = vld [vmem:[#allocation7 + $0x204] ss:$16 sps:$4 sm:$0xff]   ;;  %v5475_v57 = vld [vmem:[#allocation7 + $0x20c] ss:$16 sps:$4 sm:$0xff]  }
 0x1db   : > { %1818 = vmatprep.subr.bf16.mxu1 %v5382_v59  ;;  %1904 = vmatprep.subr.bf16.mxu0 %v5385_v60  ;;  %v749_v59 = vshrl.u32 %v748_v58, 7  ;;  %v5514_v58 = vld [vmem:[#allocation7 + $0x2e4] ss:$16 sps:$4 sm:$0xff]  }
 0x1dd   : > { %v6637_v60 = vsub.s32 0, %v749_v59 }
 0x1de   : > { %1819 = vmatpush1.bf16.msra.mxu1 %v5380_v61  ;;  %1905 = vmatpush1.bf16.msra.mxu0 %v5383_v62  ;;  %v6639_v61 = vsub.s32 2, %v749_v59  ;;  %v746_v62 = vld [vmem:[#allocation5] sm:$0xf] }
 0x1df   : > { %1820 = vmatprep.subr.bf16.mxu1 %v5388_v63  ;;  %1906 = vmatprep.subr.bf16.mxu0 %v5391_v1  ;;  %v6641_v63 = vsub.s32 1, %v749_v59  ;;  %v6643_v1 = vsub.s32 3, %v749_v59  ;;  %v5517_v59 = vld [vmem:[#allocation7 + $0x2ec] ss:$16 sps:$4 sm:$0xff]  }
 0x1e2   : > { %1821 = vmatpush1.bf16.msra.mxu1 %v5386_v2  ;;  %1907 = vmatpush1.bf16.msra.mxu0 %v5389_v3  ;;  %v751_v2 = vrot.slane %v746_v62, %v6637_v60  ;;  %v759_v3 = vrot.slane %v746_v62, %v6639_v61 }
 0x1e3   : > { %1822 = vmatprep.subr.bf16.mxu1 %v5394_v4  ;;  %1908 = vmatprep.subr.bf16.mxu0 %v5397_v5 }
 0x1e6   : > { %1823 = vmatpush1.bf16.msra.mxu1 %v5392_v6  ;;  %1909 = vmatpush1.bf16.msra.mxu0 %v5395_v7  ;;  %v755_v6 = vrot.slane %v746_v62, %v6641_v63  ;;  %v763_v7 = vrot.slane %v746_v62, %v6643_v1  ;;  %v5512_v62 = vld [vmem:[#allocation7 + $0x2e0] ss:$16 sps:$4 sm:$0xff]  }
 0x1e7   : > { %1824 = vmatprep.subr.bf16.mxu1 %v5400_v8  ;;  %1910 = vmatprep.subr.bf16.mxu0 %v5403_v9 }
 0x1ea   : > { %1825 = vmatpush1.bf16.msra.mxu1 %v5398_v10  ;;  %1911 = vmatpush1.bf16.msra.mxu0 %v5401_v11 }
 0x1eb   : > { %1826 = vmatprep.subr.bf16.mxu1 %v5406_v12  ;;  %1912 = vmatprep.subr.bf16.mxu0 %v5409_v13 }
 0x1ee   : > { %1827 = vmatpush1.bf16.msra.mxu1 %v5404_v14  ;;  %1913 = vmatpush1.bf16.msra.mxu0 %v5407_v15 }
 0x1ef   : > { %1828 = vmatprep.subr.bf16.mxu1 %v5412_v16  ;;  %1914 = vmatprep.subr.bf16.mxu0 %v5415_v17 }
 0x1f2   : > { %1829 = vmatpush1.bf16.msra.mxu1 %v5410_v18  ;;  %1915 = vmatpush1.bf16.msra.mxu0 %v5413_v19 }
 0x1f3   : > { %1830 = vmatprep.subr.bf16.mxu1 %v5418_v20  ;;  %1916 = vmatprep.subr.bf16.mxu0 %v5421_v21 }
 0x1f6   : > { %1831 = vmatpush1.bf16.msra.mxu1 %v5416_v22  ;;  %1917 = vmatpush1.bf16.msra.mxu0 %v5419_v23 }
 0x1f7   : > { %1832 = vmatprep.subr.bf16.mxu1 %v5424_v24  ;;  %1918 = vmatprep.subr.bf16.mxu0 %v5427_v25 }
 0x1fa   : > { %1833 = vmatpush1.bf16.msra.mxu1 %v5422_v26  ;;  %1919 = vmatpush1.bf16.msra.mxu0 %v5425_v27 }
 0x1fb   : > { %1834 = vmatprep.subr.bf16.mxu1 %v5430_v28  ;;  %1920 = vmatprep.subr.bf16.mxu0 %v5433_v29 }
 0x1fe   : > { %1835 = vmatpush1.bf16.msra.mxu1 %v5428_v30  ;;  %1921 = vmatpush1.bf16.msra.mxu0 %v5431_v31  ;;  %v5470_v30 = vld [vmem:[#allocation7 + $0x200] ss:$16 sps:$4 sm:$0xff]   ;;  %v5473_v31 = vld [vmem:[#allocation7 + $0x208] ss:$16 sps:$4 sm:$0xff]  }
 0x1ff   : > { %1836 = vmatprep.subr.bf16.mxu1 %v5436_v32  ;;  %1922 = vmatprep.subr.bf16.mxu0 %v5439_v33  ;;  %v5478_v33 = vld [vmem:[#allocation7 + $0x224] ss:$16 sps:$4 sm:$0xff]  }
 0x202   : > { %1837 = vmatpush1.bf16.msra.mxu1 %v5434_v34  ;;  %1923 = vmatpush1.bf16.msra.mxu0 %v5437_v35  ;;  %v5481_v34 = vld [vmem:[#allocation7 + $0x22c] ss:$16 sps:$4 sm:$0xff]  }
 0x203   : > { %1838 = vmatprep.subr.bf16.mxu1 %v5442_v36  ;;  %1924 = vmatprep.subr.bf16.mxu0 %v5445_v37  ;;  %v5476_v36 = vld [vmem:[#allocation7 + $0x220] ss:$16 sps:$4 sm:$0xff]   ;;  %v5479_v37 = vld [vmem:[#allocation7 + $0x228] ss:$16 sps:$4 sm:$0xff]  }
 0x206   : > { %1839 = vmatpush1.bf16.msra.mxu1 %v5440_v38  ;;  %1925 = vmatpush1.bf16.msra.mxu0 %v5443_v39  ;;  %v5484_v38 = vld [vmem:[#allocation7 + $0x244] ss:$16 sps:$4 sm:$0xff]   ;;  %v5487_v39 = vld [vmem:[#allocation7 + $0x24c] ss:$16 sps:$4 sm:$0xff]  }
 0x207   : > { %1840 = vmatprep.subr.bf16.mxu1 %v5448_v40  ;;  %1926 = vmatprep.subr.bf16.mxu0 %v5451_v41  ;;  %v5482_v40 = vld [vmem:[#allocation7 + $0x240] ss:$16 sps:$4 sm:$0xff]   ;;  %v5485_v41 = vld [vmem:[#allocation7 + $0x248] ss:$16 sps:$4 sm:$0xff]  }
 0x20a   : > { %1841 = vmatpush1.bf16.msra.mxu1 %v5446_v42  ;;  %1927 = vmatpush1.bf16.msra.mxu0 %v5449_v43  ;;  %v5490_v42 = vld [vmem:[#allocation7 + $0x264] ss:$16 sps:$4 sm:$0xff]   ;;  %v5493_v43 = vld [vmem:[#allocation7 + $0x26c] ss:$16 sps:$4 sm:$0xff]  }
 0x20b   : > { %1842 = vmatprep.subr.bf16.mxu1 %v5454_v44  ;;  %1928 = vmatprep.subr.bf16.mxu0 %v5457_v45  ;;  %v5488_v44 = vld [vmem:[#allocation7 + $0x260] ss:$16 sps:$4 sm:$0xff]   ;;  %v5491_v45 = vld [vmem:[#allocation7 + $0x268] ss:$16 sps:$4 sm:$0xff]  }
 0x20e   : > { %1843 = vmatpush1.bf16.msra.mxu1 %v5452_v46  ;;  %1929 = vmatpush1.bf16.msra.mxu0 %v5455_v47  ;;  %v5496_v46 = vld [vmem:[#allocation7 + $0x284] ss:$16 sps:$4 sm:$0xff]   ;;  %v5499_v47 = vld [vmem:[#allocation7 + $0x28c] ss:$16 sps:$4 sm:$0xff]  }
 0x20f   : > { %1844 = vmatprep.subr.bf16.mxu1 %v5460_v48  ;;  %1930 = vmatprep.subr.bf16.mxu0 %v5463_v49  ;;  %v5494_v48 = vld [vmem:[#allocation7 + $0x280] ss:$16 sps:$4 sm:$0xff]   ;;  %v5497_v49 = vld [vmem:[#allocation7 + $0x288] ss:$16 sps:$4 sm:$0xff]  }
 0x212   : > { %1845 = vmatpush1.bf16.msra.mxu1 %v5458_v50  ;;  %1931 = vmatpush1.bf16.msra.mxu0 %v5461_v51  ;;  %v5502_v50 = vld [vmem:[#allocation7 + $0x2a4] ss:$16 sps:$4 sm:$0xff]   ;;  %v5505_v51 = vld [vmem:[#allocation7 + $0x2ac] ss:$16 sps:$4 sm:$0xff]  }
 0x213   : > { %1846 = vmatprep.subr.bf16.mxu1 %v5466_v52  ;;  %1932 = vmatprep.subr.bf16.mxu0 %v5469_v53  ;;  %v5500_v52 = vld [vmem:[#allocation7 + $0x2a0] ss:$16 sps:$4 sm:$0xff]   ;;  %v5503_v53 = vld [vmem:[#allocation7 + $0x2a8] ss:$16 sps:$4 sm:$0xff]  }
 0x216   : > { %1847 = vmatpush1.bf16.msra.mxu1 %v5464_v54  ;;  %1933 = vmatpush1.bf16.msra.mxu0 %v5467_v55  ;;  %v5508_v54 = vld [vmem:[#allocation7 + $0x2c4] ss:$16 sps:$4 sm:$0xff]   ;;  %v5511_v55 = vld [vmem:[#allocation7 + $0x2cc] ss:$16 sps:$4 sm:$0xff]  }
 0x217   : > { %1859 = vmatprep.subr.bf16.mxu1 %v5472_v56  ;;  %1945 = vmatprep.subr.bf16.mxu0 %v5475_v57  ;;  %v5506_v56 = vld [vmem:[#allocation7 + $0x2c0] ss:$16 sps:$4 sm:$0xff]   ;;  %v5509_v57 = vld [vmem:[#allocation7 + $0x2c8] ss:$16 sps:$4 sm:$0xff]  }
 0x2ac   : > { %v962_v4 = vpop.f32.mrb[0].mxu1  ;;  %v1005_v5 = vpop.f32.mrb[4].mxu0 }
 0x2ad   : > { %v964_v8 = vpop.f32.mrb[1].mxu1  ;;  %v1007_v9 = vpop.f32.mrb[5].mxu0  ;;  %v963_v12 = vadd.f32 %v962_v4, %v751_v2  ;;  %v1006_v13 = vadd.f32 %v1005_v5, %v759_v3  ;;  %v5523_v4 = vld [vmem:[#allocation7 + $0x30c] ss:$16 sps:$4 sm:$0xff]   ;;  %v5518_v5 = vld [vmem:[#allocation7 + $0x300] ss:$16 sps:$4 sm:$0xff]  }
 0x2ae   : > { %v966_v10 = vpop.f32.mrb[2].mxu1  ;;  %v1009_v11 = vpop.f32.mrb[6].mxu0  ;;  %v965_v18 = vadd.f32 %v964_v8, %v755_v6  ;;  %v1008_v19 = vadd.f32 %v1007_v9, %v763_v7  ;;  %v5529_v8 = vld [vmem:[#allocation7 + $0x32c] ss:$16 sps:$4 sm:$0xff]   ;;  %v5524_v9 = vld [vmem:[#allocation7 + $0x320] ss:$16 sps:$4 sm:$0xff]  }
 0x2af   : > { %v967_v14 = vadd.f32 %v966_v10, %v751_v2  ;;  %v1010_v15 = vadd.f32 %v1009_v11, %v759_v3  ;;  %v968_v16 = vpop.f32.mrb[3].mxu1  ;;  %v1011_v17 = vpop.f32.mrb[7].mxu0  ;;  %v5515_v2 = vld [vmem:[#allocation7 + $0x2e8] ss:$16 sps:$4 sm:$0xff]   ;;  %v5520_v3 = vld [vmem:[#allocation7 + $0x304] ss:$16 sps:$4 sm:$0xff]  }
 0x2b0   : > { %v969_v20 = vadd.f32 %v968_v16, %v755_v6  ;;  %v1012_v21 = vadd.f32 %v1011_v17, %v763_v7  ;;  %v5521_v6 = vld [vmem:[#allocation7 + $0x308] ss:$16 sps:$4 sm:$0xff]   ;;  %v5526_v7 = vld [vmem:[#allocation7 + $0x324] ss:$16 sps:$4 sm:$0xff]   ;;  %v5541_v16 = vld [vmem:[#allocation7 + $0x36c] ss:$16 sps:$4 sm:$0xff]  }
 0x2b1   : > { %v1014_v22 = vpack.c.bf16 %v967_v14, %v963_v12  ;;  %v6649_v23 = vpack.c.bf16 %v1010_v15, %v1006_v13  ;;  %v5527_v10 = vld [vmem:[#allocation7 + $0x328] ss:$16 sps:$4 sm:$0xff]   ;;  %v5532_v11 = vld [vmem:[#allocation7 + $0x344] ss:$16 sps:$4 sm:$0xff]   ;;  %v5535_v12 = vld [vmem:[#allocation7 + $0x34c] ss:$16 sps:$4 sm:$0xff]  }
 0x2b2   : > { %v1015_v24 = vpack.c.bf16 %v969_v20, %v965_v18  ;;  %v1017_v25 = vpack.c.bf16 %v1012_v21, %v1008_v19  ;;  %v5530_v13 = vld [vmem:[#allocation7 + $0x340] ss:$16 sps:$4 sm:$0xff]   ;;  %v5533_v14 = vld [vmem:[#allocation7 + $0x348] ss:$16 sps:$4 sm:$0xff]   ;;  %v5538_v15 = vld [vmem:[#allocation7 + $0x364] ss:$16 sps:$4 sm:$0xff]  }
 0x2b3   : > { %v1018_v26 = vmul.bf16 1009007652, %v1014_v22  ;;  %v5536_v17 = vld [vmem:[#allocation7 + $0x360] ss:$16 sps:$4 sm:$0xff]   ;;  %v5539_v18 = vld [vmem:[#allocation7 + $0x368] ss:$16 sps:$4 sm:$0xff]  }
 0x2b4   : > { %v1019_v27 = vmul.bf16 1009007652, %v1015_v24  ;;  %v1021_v28 = vmul.bf16 1009007652, %v1017_v25  ;;  %v5544_v19 = vld [vmem:[#allocation7 + $0x384] ss:$16 sps:$4 sm:$0xff]  }
 0x2b5   : > { %v1022_v32 = vmax.bf16 %v1018_v26, %v1014_v22  ;;  %v5547_v20 = vld [vmem:[#allocation7 + $0x38c] ss:$16 sps:$4 sm:$0xff]   ;;  %v5542_v21 = vld [vmem:[#allocation7 + $0x380] ss:$16 sps:$4 sm:$0xff]   ;;  %v5545_v22 = vld [vmem:[#allocation7 + $0x388] ss:$16 sps:$4 sm:$0xff]  }
 0x2b6   : > { %v1023_v29 = vmax.bf16 %v1019_v27, %v1015_v24  ;;  %v1025_v35 = vmax.bf16 %v1021_v28, %v1017_v25  ;;  %v5550_v24 = vld [vmem:[#allocation7 + $0x3a4] ss:$16 sps:$4 sm:$0xff]   ;;  %v5553_v25 = vld [vmem:[#allocation7 + $0x3ac] ss:$16 sps:$4 sm:$0xff]   ;;  %v5548_v26 = vld [vmem:[#allocation7 + $0x3a0] ss:$16 sps:$4 sm:$0xff]  }
 0x2b7   : > { %v5551_v27 = vld [vmem:[#allocation7 + $0x3a8] ss:$16 sps:$4 sm:$0xff]   ;;  %v5556_v28 = vld [vmem:[#allocation7 + $0x3c4] ss:$16 sps:$4 sm:$0xff]  }
 0x2b8   : > { %1848 = vmatprep.mubr.bf16.mxu1 %v1023_v29  ;;  %1934 = vmatprep.mubr.bf16.mxu0 %v1023_v29  ;;  %v5559_v29 = vld [vmem:[#allocation7 + $0x3cc] ss:$16 sps:$4 sm:$0xff]  }
 0x2b9   : > { %1849 = vmatmul.mubr.bf16.vlgmr.msra.gmra.mrb[4].mxu1 %v1022_v32  ;;  %1935 = vmatmul.mubr.bf16.vlgmr.msra.gmra.mrb[8].mxu0 %v1022_v32  ;;  %v5562_v32 = vld [vmem:[#allocation7 + $0x3e4] ss:$16 sps:$4 sm:$0xff]  }
 0x2ba   : > { %1860 = vmatpush1.bf16.msra.mxu1 %v5470_v30  ;;  %1946 = vmatpush1.bf16.msra.mxu0 %v5473_v31  ;;  %v5554_v30 = vld [vmem:[#allocation7 + $0x3c0] ss:$16 sps:$4 sm:$0xff]   ;;  %v5557_v31 = vld [vmem:[#allocation7 + $0x3c8] ss:$16 sps:$4 sm:$0xff]  }
 0x2bb   : > { %1891 = vmatprep.mubr.bf16.mxu1 %v1025_v35  ;;  %1977 = vmatprep.mubr.bf16.mxu0 %v1025_v35  ;;  %v5563_v35 = vld [vmem:[#allocation7 + $0x3e8] ss:$16 sps:$4 sm:$0xff]  }
 0x2bc   : > { %1861 = vmatprep.subr.bf16.mxu1 %v5478_v33  ;;  %1947 = vmatprep.subr.bf16.mxu0 %v5481_v34  ;;  %v5565_v33 = vld [vmem:[#allocation7 + $0x3ec] ss:$16 sps:$4 sm:$0xff]   ;;  %v5560_v34 = vld [vmem:[#allocation7 + $0x3e0] ss:$16 sps:$4 sm:$0xff]  }
 0x2be   : > { %1862 = vmatpush1.bf16.msra.mxu1 %v5476_v36  ;;  %1948 = vmatpush1.bf16.msra.mxu0 %v5479_v37  ;;  %v1020_v36 = vmul.bf16 1009007652, %v6649_v23  ;;  %v5568_v37 = vld [vmem:[#allocation10 + $0x4] ss:$16 sps:$4 sm:$0xff]  }
 0x2bf   : > { %1863 = vmatprep.subr.bf16.mxu1 %v5484_v38  ;;  %1949 = vmatprep.subr.bf16.mxu0 %v5487_v39  ;;  %v5571_v38 = vld [vmem:[#allocation10 + $0xc] ss:$16 sps:$4 sm:$0xff]   ;;  %v5566_v39 = vld [vmem:[#allocation10] ss:$16 sps:$4 sm:$0xff]  }
 0x2c2   : > { %1864 = vmatpush1.bf16.msra.mxu1 %v5482_v40  ;;  %1950 = vmatpush1.bf16.msra.mxu0 %v5485_v41  ;;  %v5569_v40 = vld [vmem:[#allocation10 + $0x8] ss:$16 sps:$4 sm:$0xff]   ;;  %v1024_v41 = vmax.bf16 %v1020_v36, %v6649_v23  ;;  %v5586_v23 = vld [vmem:[#allocation10 + $0x64] ss:$16 sps:$4 sm:$0xff]   ;;  %v5655_v36 = vld [vmem:[#allocation10 + $0x1cc] ss:$16 sps:$4 sm:$0xff]  }
 0x2c3   : > { %1865 = vmatprep.subr.bf16.mxu1 %v5490_v42  ;;  %1951 = vmatprep.subr.bf16.mxu0 %v5493_v43  ;;  %v5574_v42 = vld [vmem:[#allocation10 + $0x24] ss:$16 sps:$4 sm:$0xff]   ;;  %v5577_v43 = vld [vmem:[#allocation10 + $0x2c] ss:$16 sps:$4 sm:$0xff]  }
 0x2c6   : > { %1866 = vmatpush1.bf16.msra.mxu1 %v5488_v44  ;;  %1952 = vmatpush1.bf16.msra.mxu0 %v5491_v45  ;;  %v5572_v44 = vld [vmem:[#allocation10 + $0x20] ss:$16 sps:$4 sm:$0xff]   ;;  %v5575_v45 = vld [vmem:[#allocation10 + $0x28] ss:$16 sps:$4 sm:$0xff]  }
 0x2c7   : > { %1867 = vmatprep.subr.bf16.mxu1 %v5496_v46  ;;  %1953 = vmatprep.subr.bf16.mxu0 %v5499_v47  ;;  %v5580_v46 = vld [vmem:[#allocation10 + $0x44] ss:$16 sps:$4 sm:$0xff]   ;;  %v5583_v47 = vld [vmem:[#allocation10 + $0x4c] ss:$16 sps:$4 sm:$0xff]  }
 0x2ca   : > { %1868 = vmatpush1.bf16.msra.mxu1 %v5494_v48  ;;  %1954 = vmatpush1.bf16.msra.mxu0 %v5497_v49  ;;  %v5578_v48 = vld [vmem:[#allocation10 + $0x40] ss:$16 sps:$4 sm:$0xff]   ;;  %v5581_v49 = vld [vmem:[#allocation10 + $0x48] ss:$16 sps:$4 sm:$0xff]  }
 0x2cb   : > { %1869 = vmatprep.subr.bf16.mxu1 %v5502_v50  ;;  %1955 = vmatprep.subr.bf16.mxu0 %v5505_v51  ;;  %v5589_v50 = vld [vmem:[#allocation10 + $0x6c] ss:$16 sps:$4 sm:$0xff]   ;;  %v5584_v51 = vld [vmem:[#allocation10 + $0x60] ss:$16 sps:$4 sm:$0xff]  }
 0x2ce   : > { %1870 = vmatpush1.bf16.msra.mxu1 %v5500_v52  ;;  %1956 = vmatpush1.bf16.msra.mxu0 %v5503_v53  ;;  %v5587_v52 = vld [vmem:[#allocation10 + $0x68] ss:$16 sps:$4 sm:$0xff]   ;;  %v5592_v53 = vld [vmem:[#allocation10 + $0x84] ss:$16 sps:$4 sm:$0xff]  }
 0x2cf   : > { %1871 = vmatprep.subr.bf16.mxu1 %v5508_v54  ;;  %1957 = vmatprep.subr.bf16.mxu0 %v5511_v55  ;;  %v5595_v54 = vld [vmem:[#allocation10 + $0x8c] ss:$16 sps:$4 sm:$0xff]   ;;  %v5590_v55 = vld [vmem:[#allocation10 + $0x80] ss:$16 sps:$4 sm:$0xff]  }
 0x2d2   : > { %1872 = vmatpush1.bf16.msra.mxu1 %v5506_v56  ;;  %1958 = vmatpush1.bf16.msra.mxu0 %v5509_v57  ;;  %v5593_v56 = vld [vmem:[#allocation10 + $0x88] ss:$16 sps:$4 sm:$0xff]   ;;  %v5598_v57 = vld [vmem:[#allocation10 + $0xa4] ss:$16 sps:$4 sm:$0xff]  }
 0x2d3   : > { %1873 = vmatprep.subr.bf16.mxu1 %v5514_v58  ;;  %1959 = vmatprep.subr.bf16.mxu0 %v5517_v59  ;;  %v5601_v58 = vld [vmem:[#allocation10 + $0xac] ss:$16 sps:$4 sm:$0xff]   ;;  %v5596_v59 = vld [vmem:[#allocation10 + $0xa0] ss:$16 sps:$4 sm:$0xff]  }
 0x2d6   : > { %1874 = vmatpush1.bf16.msra.mxu1 %v5512_v62  ;;  %1960 = vmatpush1.bf16.msra.mxu0 %v5515_v2  ;;  %v5599_v62 = vld [vmem:[#allocation10 + $0xa8] ss:$16 sps:$4 sm:$0xff]   ;;  %v5604_v2 = vld [vmem:[#allocation10 + $0xc4] ss:$16 sps:$4 sm:$0xff]  }
 0x2d7   : > { %1875 = vmatprep.subr.bf16.mxu1 %v5520_v3  ;;  %1961 = vmatprep.subr.bf16.mxu0 %v5523_v4  ;;  %v5607_v3 = vld [vmem:[#allocation10 + $0xcc] ss:$16 sps:$4 sm:$0xff]   ;;  %v5602_v4 = vld [vmem:[#allocation10 + $0xc0] ss:$16 sps:$4 sm:$0xff]  }
 0x2da   : > { %1876 = vmatpush1.bf16.msra.mxu1 %v5518_v5  ;;  %1962 = vmatpush1.bf16.msra.mxu0 %v5521_v6  ;;  %v5605_v5 = vld [vmem:[#allocation10 + $0xc8] ss:$16 sps:$4 sm:$0xff]   ;;  %v5610_v6 = vld [vmem:[#allocation10 + $0xe4] ss:$16 sps:$4 sm:$0xff]  }
 0x2db   : > { %1877 = vmatprep.subr.bf16.mxu1 %v5526_v7  ;;  %1963 = vmatprep.subr.bf16.mxu0 %v5529_v8  ;;  %v5613_v7 = vld [vmem:[#allocation10 + $0xec] ss:$16 sps:$4 sm:$0xff]   ;;  %v5608_v8 = vld [vmem:[#allocation10 + $0xe0] ss:$16 sps:$4 sm:$0xff]  }
 0x2de   : > { %1878 = vmatpush1.bf16.msra.mxu1 %v5524_v9  ;;  %1964 = vmatpush1.bf16.msra.mxu0 %v5527_v10  ;;  %v5611_v9 = vld [vmem:[#allocation10 + $0xe8] ss:$16 sps:$4 sm:$0xff]   ;;  %v5616_v10 = vld [vmem:[#allocation10 + $0x104] ss:$16 sps:$4 sm:$0xff]  }
 0x2df   : > { %1879 = vmatprep.subr.bf16.mxu1 %v5532_v11  ;;  %1965 = vmatprep.subr.bf16.mxu0 %v5535_v12  ;;  %v5619_v11 = vld [vmem:[#allocation10 + $0x10c] ss:$16 sps:$4 sm:$0xff]   ;;  %v5614_v12 = vld [vmem:[#allocation10 + $0x100] ss:$16 sps:$4 sm:$0xff]  }
 0x2e2   : > { %1880 = vmatpush1.bf16.msra.mxu1 %v5530_v13  ;;  %1966 = vmatpush1.bf16.msra.mxu0 %v5533_v14  ;;  %v5617_v13 = vld [vmem:[#allocation10 + $0x108] ss:$16 sps:$4 sm:$0xff]   ;;  %v5622_v14 = vld [vmem:[#allocation10 + $0x124] ss:$16 sps:$4 sm:$0xff]  }
 0x2e3   : > { %1881 = vmatprep.subr.bf16.mxu1 %v5538_v15  ;;  %1967 = vmatprep.subr.bf16.mxu0 %v5541_v16  ;;  %v5625_v15 = vld [vmem:[#allocation10 + $0x12c] ss:$16 sps:$4 sm:$0xff]   ;;  %v5620_v16 = vld [vmem:[#allocation10 + $0x120] ss:$16 sps:$4 sm:$0xff]  }
 0x2e6   : > { %1882 = vmatpush1.bf16.msra.mxu1 %v5536_v17  ;;  %1968 = vmatpush1.bf16.msra.mxu0 %v5539_v18  ;;  %v5623_v17 = vld [vmem:[#allocation10 + $0x128] ss:$16 sps:$4 sm:$0xff]   ;;  %v5628_v18 = vld [vmem:[#allocation10 + $0x144] ss:$16 sps:$4 sm:$0xff]  }
 0x2e7   : > { %1883 = vmatprep.subr.bf16.mxu1 %v5544_v19  ;;  %1969 = vmatprep.subr.bf16.mxu0 %v5547_v20  ;;  %v5631_v19 = vld [vmem:[#allocation10 + $0x14c] ss:$16 sps:$4 sm:$0xff]   ;;  %v5626_v20 = vld [vmem:[#allocation10 + $0x140] ss:$16 sps:$4 sm:$0xff]  }
 0x2ea   : > { %1884 = vmatpush1.bf16.msra.mxu1 %v5542_v21  ;;  %1970 = vmatpush1.bf16.msra.mxu0 %v5545_v22  ;;  %v5629_v21 = vld [vmem:[#allocation10 + $0x148] ss:$16 sps:$4 sm:$0xff]   ;;  %v5634_v22 = vld [vmem:[#allocation10 + $0x164] ss:$16 sps:$4 sm:$0xff]  }
 0x2eb   : > { %1885 = vmatprep.subr.bf16.mxu1 %v5550_v24  ;;  %1971 = vmatprep.subr.bf16.mxu0 %v5553_v25  ;;  %v5637_v24 = vld [vmem:[#allocation10 + $0x16c] ss:$16 sps:$4 sm:$0xff]   ;;  %v5632_v25 = vld [vmem:[#allocation10 + $0x160] ss:$16 sps:$4 sm:$0xff]  }
 0x2ee   : > { %1886 = vmatpush1.bf16.msra.mxu1 %v5548_v26  ;;  %1972 = vmatpush1.bf16.msra.mxu0 %v5551_v27  ;;  %v5635_v26 = vld [vmem:[#allocation10 + $0x168] ss:$16 sps:$4 sm:$0xff]   ;;  %v5640_v27 = vld [vmem:[#allocation10 + $0x184] ss:$16 sps:$4 sm:$0xff]  }
 0x2ef   : > { %1887 = vmatprep.subr.bf16.mxu1 %v5556_v28  ;;  %1973 = vmatprep.subr.bf16.mxu0 %v5559_v29  ;;  %v5643_v28 = vld [vmem:[#allocation10 + $0x18c] ss:$16 sps:$4 sm:$0xff]   ;;  %v5638_v29 = vld [vmem:[#allocation10 + $0x180] ss:$16 sps:$4 sm:$0xff]  }
 0x2f2   : > { %1888 = vmatpush1.bf16.msra.mxu1 %v5554_v30  ;;  %1974 = vmatpush1.bf16.msra.mxu0 %v5557_v31  ;;  %v5641_v30 = vld [vmem:[#allocation10 + $0x188] ss:$16 sps:$4 sm:$0xff]   ;;  %v5646_v31 = vld [vmem:[#allocation10 + $0x1a4] ss:$16 sps:$4 sm:$0xff]  }
 0x2f3   : > { %1889 = vmatprep.subr.bf16.mxu1 %v5562_v32  ;;  %1975 = vmatprep.subr.bf16.mxu0 %v5565_v33  ;;  %v5649_v32 = vld [vmem:[#allocation10 + $0x1ac] ss:$16 sps:$4 sm:$0xff]   ;;  %v5644_v33 = vld [vmem:[#allocation10 + $0x1a0] ss:$16 sps:$4 sm:$0xff]  }
 0x2f6   : > { %1890 = vmatpush1.bf16.msra.mxu1 %v5560_v34  ;;  %1976 = vmatpush1.bf16.msra.mxu0 %v5563_v35  ;;  %v5647_v34 = vld [vmem:[#allocation10 + $0x1a8] ss:$16 sps:$4 sm:$0xff]   ;;  %v5652_v35 = vld [vmem:[#allocation10 + $0x1c4] ss:$16 sps:$4 sm:$0xff]  }
 0x2f7   : > { %2790 = vmatprep.subr.bf16.mxu1 %v5568_v37  ;;  %2876 = vmatprep.subr.bf16.mxu0 %v5571_v38  ;;  %v5650_v37 = vld [vmem:[#allocation10 + $0x1c0] ss:$16 sps:$4 sm:$0xff]   ;;  %v5653_v38 = vld [vmem:[#allocation10 + $0x1c8] ss:$16 sps:$4 sm:$0xff]  }
 0x2f9   : > { %1892 = vmatmul.mubr.bf16.vlgmr.msra.gmra.mrb[4].mxu1 %v1024_v41  ;;  %1978 = vmatmul.mubr.bf16.vlgmr.msra.gmra.mrb[8].mxu0 %v1024_v41  ;;  %v5656_v41 = vld [vmem:[#allocation10 + $0x1e0] ss:$16 sps:$4 sm:$0xff]  }
 0x2fa   : > { %2791 = vmatpush1.bf16.msra.mxu1 %v5566_v39  ;;  %2877 = vmatpush1.bf16.msra.mxu0 %v5569_v40  ;;  %v5658_v39 = vld [vmem:[#allocation10 + $0x1e4] ss:$16 sps:$4 sm:$0xff]   ;;  %v5661_v40 = vld [vmem:[#allocation10 + $0x1ec] ss:$16 sps:$4 sm:$0xff]  }
 0x2fb   : > { %2792 = vmatprep.subr.bf16.mxu1 %v5574_v42  ;;  %2878 = vmatprep.subr.bf16.mxu0 %v5577_v43  ;;  %v5659_v42 = vld [vmem:[#allocation10 + $0x1e8] ss:$16 sps:$4 sm:$0xff]   ;;  %v5664_v43 = vld [vmem:[#allocation10 + $0x204] ss:$16 sps:$4 sm:$0xff]  }
 0x2fe   : > { %2793 = vmatpush1.bf16.msra.mxu1 %v5572_v44  ;;  %2879 = vmatpush1.bf16.msra.mxu0 %v5575_v45  ;;  %v5667_v44 = vld [vmem:[#allocation10 + $0x20c] ss:$16 sps:$4 sm:$0xff]  }
 0x2ff   : > { %2794 = vmatprep.subr.bf16.mxu1 %v5580_v46  ;;  %2880 = vmatprep.subr.bf16.mxu0 %v5583_v47  ;;  %v1154_v45 = vld [vmem:[#allocation8] sm:$0xf] }
 0x300   : > { %v1159_v46 = vrot.slane %v1154_v45, %v6637_v60  ;;  %v1167_v47 = vrot.slane %v1154_v45, %v6639_v61 }
 0x302   : > { %2795 = vmatpush1.bf16.msra.mxu1 %v5578_v48  ;;  %2881 = vmatpush1.bf16.msra.mxu0 %v5581_v49 }
 0x303   : > { %2796 = vmatprep.subr.bf16.mxu1 %v5586_v23  ;;  %2882 = vmatprep.subr.bf16.mxu0 %v5589_v50  ;;  %v1163_v23 = vrot.slane %v1154_v45, %v6641_v63  ;;  %v1171_v50 = vrot.slane %v1154_v45, %v6643_v1  ;;  %v5704_v45 = vld [vmem:[#allocation10 + $0x2e0] ss:$16 sps:$4 sm:$0xff]  }
 0x306   : > { %2797 = vmatpush1.bf16.msra.mxu1 %v5584_v51  ;;  %2883 = vmatpush1.bf16.msra.mxu0 %v5587_v52 }
 0x307   : > { %2798 = vmatprep.subr.bf16.mxu1 %v5592_v53  ;;  %2884 = vmatprep.subr.bf16.mxu0 %v5595_v54 }
 0x30a   : > { %2799 = vmatpush1.bf16.msra.mxu1 %v5590_v55  ;;  %2885 = vmatpush1.bf16.msra.mxu0 %v5593_v56 }
 0x30b   : > { %2800 = vmatprep.subr.bf16.mxu1 %v5598_v57  ;;  %2886 = vmatprep.subr.bf16.mxu0 %v5601_v58 }
 0x30e   : > { %2801 = vmatpush1.bf16.msra.mxu1 %v5596_v59  ;;  %2887 = vmatpush1.bf16.msra.mxu0 %v5599_v62 }
 0x30f   : > { %2802 = vmatprep.subr.bf16.mxu1 %v5604_v2  ;;  %2888 = vmatprep.subr.bf16.mxu0 %v5607_v3 }
 0x312   : > { %2803 = vmatpush1.bf16.msra.mxu1 %v5602_v4  ;;  %2889 = vmatpush1.bf16.msra.mxu0 %v5605_v5 }
 0x313   : > { %2804 = vmatprep.subr.bf16.mxu1 %v5610_v6  ;;  %2890 = vmatprep.subr.bf16.mxu0 %v5613_v7 }
 0x316   : > { %2805 = vmatpush1.bf16.msra.mxu1 %v5608_v8  ;;  %2891 = vmatpush1.bf16.msra.mxu0 %v5611_v9 }
 0x317   : > { %2806 = vmatprep.subr.bf16.mxu1 %v5616_v10  ;;  %2892 = vmatprep.subr.bf16.mxu0 %v5619_v11 }
 0x31a   : > { %2807 = vmatpush1.bf16.msra.mxu1 %v5614_v12  ;;  %2893 = vmatpush1.bf16.msra.mxu0 %v5617_v13 }
 0x31b   : > { %2808 = vmatprep.subr.bf16.mxu1 %v5622_v14  ;;  %2894 = vmatprep.subr.bf16.mxu0 %v5625_v15  ;;  %v5662_v14 = vld [vmem:[#allocation10 + $0x200] ss:$16 sps:$4 sm:$0xff]   ;;  %v5665_v15 = vld [vmem:[#allocation10 + $0x208] ss:$16 sps:$4 sm:$0xff]  }
 0x31e   : > { %2809 = vmatpush1.bf16.msra.mxu1 %v5620_v16  ;;  %2895 = vmatpush1.bf16.msra.mxu0 %v5623_v17  ;;  %v5670_v17 = vld [vmem:[#allocation10 + $0x224] ss:$16 sps:$4 sm:$0xff]  }
 0x31f   : > { %2810 = vmatprep.subr.bf16.mxu1 %v5628_v18  ;;  %2896 = vmatprep.subr.bf16.mxu0 %v5631_v19  ;;  %v5673_v18 = vld [vmem:[#allocation10 + $0x22c] ss:$16 sps:$4 sm:$0xff]  }
 0x322   : > { %2811 = vmatpush1.bf16.msra.mxu1 %v5626_v20  ;;  %2897 = vmatpush1.bf16.msra.mxu0 %v5629_v21  ;;  %v5668_v20 = vld [vmem:[#allocation10 + $0x220] ss:$16 sps:$4 sm:$0xff]   ;;  %v5671_v21 = vld [vmem:[#allocation10 + $0x228] ss:$16 sps:$4 sm:$0xff]  }
 0x323   : > { %2812 = vmatprep.subr.bf16.mxu1 %v5634_v22  ;;  %2898 = vmatprep.subr.bf16.mxu0 %v5637_v24  ;;  %v5676_v22 = vld [vmem:[#allocation10 + $0x244] ss:$16 sps:$4 sm:$0xff]   ;;  %v5679_v24 = vld [vmem:[#allocation10 + $0x24c] ss:$16 sps:$4 sm:$0xff]  }
 0x326   : > { %2813 = vmatpush1.bf16.msra.mxu1 %v5632_v25  ;;  %2899 = vmatpush1.bf16.msra.mxu0 %v5635_v26  ;;  %v5674_v25 = vld [vmem:[#allocation10 + $0x240] ss:$16 sps:$4 sm:$0xff]   ;;  %v5677_v26 = vld [vmem:[#allocation10 + $0x248] ss:$16 sps:$4 sm:$0xff]  }
 0x327   : > { %2814 = vmatprep.subr.bf16.mxu1 %v5640_v27  ;;  %2900 = vmatprep.subr.bf16.mxu0 %v5643_v28  ;;  %v5682_v27 = vld [vmem:[#allocation10 + $0x264] ss:$16 sps:$4 sm:$0xff]   ;;  %v5685_v28 = vld [vmem:[#allocation10 + $0x26c] ss:$16 sps:$4 sm:$0xff]  }
 0x32a   : > { %2815 = vmatpush1.bf16.msra.mxu1 %v5638_v29  ;;  %2901 = vmatpush1.bf16.msra.mxu0 %v5641_v30  ;;  %v5680_v29 = vld [vmem:[#allocation10 + $0x260] ss:$16 sps:$4 sm:$0xff]   ;;  %v5683_v30 = vld [vmem:[#allocation10 + $0x268] ss:$16 sps:$4 sm:$0xff]  }
 0x32b   : > { %2816 = vmatprep.subr.bf16.mxu1 %v5646_v31  ;;  %2902 = vmatprep.subr.bf16.mxu0 %v5649_v32  ;;  %v5688_v31 = vld [vmem:[#allocation10 + $0x284] ss:$16 sps:$4 sm:$0xff]   ;;  %v5691_v32 = vld [vmem:[#allocation10 + $0x28c] ss:$16 sps:$4 sm:$0xff]  }
 0x32e   : > { %2817 = vmatpush1.bf16.msra.mxu1 %v5644_v33  ;;  %2903 = vmatpush1.bf16.msra.mxu0 %v5647_v34  ;;  %v5686_v33 = vld [vmem:[#allocation10 + $0x280] ss:$16 sps:$4 sm:$0xff]   ;;  %v5689_v34 = vld [vmem:[#allocation10 + $0x288] ss:$16 sps:$4 sm:$0xff]  }
 0x32f   : > { %2818 = vmatprep.subr.bf16.mxu1 %v5652_v35  ;;  %2904 = vmatprep.subr.bf16.mxu0 %v5655_v36  ;;  %v5694_v35 = vld [vmem:[#allocation10 + $0x2a4] ss:$16 sps:$4 sm:$0xff]   ;;  %v5697_v36 = vld [vmem:[#allocation10 + $0x2ac] ss:$16 sps:$4 sm:$0xff]  }
 0x332   : > { %2819 = vmatpush1.bf16.msra.mxu1 %v5650_v37  ;;  %2905 = vmatpush1.bf16.msra.mxu0 %v5653_v38  ;;  %v5692_v37 = vld [vmem:[#allocation10 + $0x2a0] ss:$16 sps:$4 sm:$0xff]   ;;  %v5695_v38 = vld [vmem:[#allocation10 + $0x2a8] ss:$16 sps:$4 sm:$0xff]  }
 0x333   : > { %2820 = vmatprep.subr.bf16.mxu1 %v5658_v39  ;;  %2906 = vmatprep.subr.bf16.mxu0 %v5661_v40  ;;  %v5700_v39 = vld [vmem:[#allocation10 + $0x2c4] ss:$16 sps:$4 sm:$0xff]   ;;  %v5703_v40 = vld [vmem:[#allocation10 + $0x2cc] ss:$16 sps:$4 sm:$0xff]  }
 0x336   : > { %2821 = vmatpush1.bf16.msra.mxu1 %v5656_v41  ;;  %2907 = vmatpush1.bf16.msra.mxu0 %v5659_v42  ;;  %v5698_v41 = vld [vmem:[#allocation10 + $0x2c0] ss:$16 sps:$4 sm:$0xff]   ;;  %v5701_v42 = vld [vmem:[#allocation10 + $0x2c8] ss:$16 sps:$4 sm:$0xff]  }
 0x337   : > { %2833 = vmatprep.subr.bf16.mxu1 %v5664_v43  ;;  %2919 = vmatprep.subr.bf16.mxu0 %v5667_v44  ;;  %v5706_v43 = vld [vmem:[#allocation10 + $0x2e4] ss:$16 sps:$4 sm:$0xff]   ;;  %v5709_v44 = vld [vmem:[#allocation10 + $0x2ec] ss:$16 sps:$4 sm:$0xff]  }
 0x3cc   : > { %v1893_v48 = vpop.f32.mrb[4].mxu1  ;;  %v1979_v49 = vpop.f32.mrb[8].mxu0 }
 0x3cd   : > { %v1895_v51 = vpop.f32.mrb[5].mxu1  ;;  %v1981_v52 = vpop.f32.mrb[9].mxu0  ;;  %v5151_v55 = vadd.f32 %v1893_v48, %v1159_v46  ;;  %v5155_v56 = vadd.f32 %v1979_v49, %v1167_v47  ;;  %v5715_v48 = vld [vmem:[#allocation10 + $0x30c] ss:$16 sps:$4 sm:$0xff]   ;;  %v5710_v49 = vld [vmem:[#allocation10 + $0x300] ss:$16 sps:$4 sm:$0xff]  }
 0x3ce   : > { %v1897_v53 = vpop.f32.mrb[6].mxu1  ;;  %v1983_v54 = vpop.f32.mrb[10].mxu0  ;;  %v5152_v2 = vadd.f32 %v1895_v51, %v1163_v23  ;;  %v5156_v3 = vadd.f32 %v1981_v52, %v1171_v50  ;;  %v5721_v51 = vld [vmem:[#allocation10 + $0x32c] ss:$16 sps:$4 sm:$0xff]   ;;  %v5716_v52 = vld [vmem:[#allocation10 + $0x320] ss:$16 sps:$4 sm:$0xff]  }
 0x3cf   : > { %v5153_v57 = vadd.f32 %v1897_v53, %v1159_v46  ;;  %v5157_v58 = vadd.f32 %v1983_v54, %v1167_v47  ;;  %v1899_v59 = vpop.f32.mrb[7].mxu1  ;;  %v1985_v62 = vpop.f32.mrb[11].mxu0  ;;  %v5707_v46 = vld [vmem:[#allocation10 + $0x2e8] ss:$16 sps:$4 sm:$0xff]   ;;  %v5712_v47 = vld [vmem:[#allocation10 + $0x304] ss:$16 sps:$4 sm:$0xff]  }
 0x3d0   : > { %v5154_v4 = vadd.f32 %v1899_v59, %v1163_v23  ;;  %v5158_v5 = vadd.f32 %v1985_v62, %v1171_v50  ;;  %v5713_v23 = vld [vmem:[#allocation10 + $0x308] ss:$16 sps:$4 sm:$0xff]   ;;  %v5718_v50 = vld [vmem:[#allocation10 + $0x324] ss:$16 sps:$4 sm:$0xff]   ;;  %v5733_v59 = vld [vmem:[#allocation10 + $0x36c] ss:$16 sps:$4 sm:$0xff]  }
 0x3d1   : > { %v1988_v6 = vpack.c.bf16 %v5153_v57, %v5151_v55  ;;  %v6657_v7 = vpack.c.bf16 %v5157_v58, %v5155_v56  ;;  %v5719_v53 = vld [vmem:[#allocation10 + $0x328] ss:$16 sps:$4 sm:$0xff]   ;;  %v5724_v54 = vld [vmem:[#allocation10 + $0x344] ss:$16 sps:$4 sm:$0xff]   ;;  %v5727_v55 = vld [vmem:[#allocation10 + $0x34c] ss:$16 sps:$4 sm:$0xff]  }
 0x3d2   : > { %v1989_v8 = vpack.c.bf16 %v5154_v4, %v5152_v2  ;;  %v1991_v9 = vpack.c.bf16 %v5158_v5, %v5156_v3  ;;  %v5722_v56 = vld [vmem:[#allocation10 + $0x340] ss:$16 sps:$4 sm:$0xff]   ;;  %v5725_v57 = vld [vmem:[#allocation10 + $0x348] ss:$16 sps:$4 sm:$0xff]   ;;  %v5730_v58 = vld [vmem:[#allocation10 + $0x364] ss:$16 sps:$4 sm:$0xff]  }
 0x3d3   : > { %v1992_v10 = vmul.bf16 1009007652, %v1988_v6  ;;  %v5728_v62 = vld [vmem:[#allocation10 + $0x360] ss:$16 sps:$4 sm:$0xff]   ;;  %v5731_v2 = vld [vmem:[#allocation10 + $0x368] ss:$16 sps:$4 sm:$0xff]  }
 0x3d4   : > { %v1993_v11 = vmul.bf16 1009007652, %v1989_v8  ;;  %v1995_v12 = vmul.bf16 1009007652, %v1991_v9  ;;  %v5736_v3 = vld [vmem:[#allocation10 + $0x384] ss:$16 sps:$4 sm:$0xff]  }
 0x3d5   : > { %v1996_v16 = vmax.bf16 %v1992_v10, %v1988_v6  ;;  %v5739_v4 = vld [vmem:[#allocation10 + $0x38c] ss:$16 sps:$4 sm:$0xff]   ;;  %v5734_v5 = vld [vmem:[#allocation10 + $0x380] ss:$16 sps:$4 sm:$0xff]   ;;  %v5737_v6 = vld [vmem:[#allocation10 + $0x388] ss:$16 sps:$4 sm:$0xff]  }
 0x3d6   : > { %v1997_v13 = vmax.bf16 %v1993_v11, %v1989_v8  ;;  %v1999_v19 = vmax.bf16 %v1995_v12, %v1991_v9  ;;  %v5742_v8 = vld [vmem:[#allocation10 + $0x3a4] ss:$16 sps:$4 sm:$0xff]   ;;  %v5745_v9 = vld [vmem:[#allocation10 + $0x3ac] ss:$16 sps:$4 sm:$0xff]   ;;  %v5740_v10 = vld [vmem:[#allocation10 + $0x3a0] ss:$16 sps:$4 sm:$0xff]  }
 0x3d7   : > { %v5743_v11 = vld [vmem:[#allocation10 + $0x3a8] ss:$16 sps:$4 sm:$0xff]   ;;  %v5748_v12 = vld [vmem:[#allocation10 + $0x3c4] ss:$16 sps:$4 sm:$0xff]  }
 0x3d8   : > { %2822 = vmatprep.mubr.bf16.mxu1 %v1997_v13  ;;  %2908 = vmatprep.mubr.bf16.mxu0 %v1997_v13  ;;  %v5751_v13 = vld [vmem:[#allocation10 + $0x3cc] ss:$16 sps:$4 sm:$0xff]  }
 0x3d9   : > { %2823 = vmatmul.mubr.bf16.vlgmr.msra.gmra.mrb[8].mxu1 %v1996_v16  ;;  %2909 = vmatmul.mubr.bf16.vlgmr.msra.gmra.mrb[12].mxu0 %v1996_v16  ;;  %v5754_v16 = vld [vmem:[#allocation10 + $0x3e4] ss:$16 sps:$4 sm:$0xff]  }
 0x3da   : > { %2834 = vmatpush1.bf16.msra.mxu1 %v5662_v14  ;;  %2920 = vmatpush1.bf16.msra.mxu0 %v5665_v15  ;;  %v5746_v14 = vld [vmem:[#allocation10 + $0x3c0] ss:$16 sps:$4 sm:$0xff]   ;;  %v5749_v15 = vld [vmem:[#allocation10 + $0x3c8] ss:$16 sps:$4 sm:$0xff]  }
 0x3db   : > { %2865 = vmatprep.mubr.bf16.mxu1 %v1999_v19  ;;  %2951 = vmatprep.mubr.bf16.mxu0 %v1999_v19  ;;  %v5755_v19 = vld [vmem:[#allocation10 + $0x3e8] ss:$16 sps:$4 sm:$0xff]  }
 0x3dc   : > { %2835 = vmatprep.subr.bf16.mxu1 %v5670_v17  ;;  %2921 = vmatprep.subr.bf16.mxu0 %v5673_v18  ;;  %v5757_v17 = vld [vmem:[#allocation10 + $0x3ec] ss:$16 sps:$4 sm:$0xff]   ;;  %v5752_v18 = vld [vmem:[#allocation10 + $0x3e0] ss:$16 sps:$4 sm:$0xff]  }
 0x3de   : > { %2836 = vmatpush1.bf16.msra.mxu1 %v5668_v20  ;;  %2922 = vmatpush1.bf16.msra.mxu0 %v5671_v21  ;;  %v1994_v20 = vmul.bf16 1009007652, %v6657_v7  ;;  %v5760_v21 = vld [vmem:[#allocation11 + $0x4] ss:$16 sps:$4 sm:$0xff]  }
 0x3df   : > { %2837 = vmatprep.subr.bf16.mxu1 %v5676_v22  ;;  %2923 = vmatprep.subr.bf16.mxu0 %v5679_v24  ;;  %v5763_v22 = vld [vmem:[#allocation11 + $0xc] ss:$16 sps:$4 sm:$0xff]   ;;  %v5758_v24 = vld [vmem:[#allocation11] ss:$16 sps:$4 sm:$0xff]  }
 0x3e2   : > { %2838 = vmatpush1.bf16.msra.mxu1 %v5674_v25  ;;  %2924 = vmatpush1.bf16.msra.mxu0 %v5677_v26  ;;  %v5761_v25 = vld [vmem:[#allocation11 + $0x8] ss:$16 sps:$4 sm:$0xff]   ;;  %v1998_v26 = vmax.bf16 %v1994_v20, %v6657_v7  ;;  %v5778_v7 = vld [vmem:[#allocation11 + $0x64] ss:$16 sps:$4 sm:$0xff]   ;;  %v5847_v20 = vld [vmem:[#allocation11 + $0x1cc] ss:$16 sps:$4 sm:$0xff]  }
 0x3e3   : > { %2839 = vmatprep.subr.bf16.mxu1 %v5682_v27  ;;  %2925 = vmatprep.subr.bf16.mxu0 %v5685_v28  ;;  %v5766_v27 = vld [vmem:[#allocation11 + $0x24] ss:$16 sps:$4 sm:$0xff]   ;;  %v5769_v28 = vld [vmem:[#allocation11 + $0x2c] ss:$16 sps:$4 sm:$0xff]  }
 0x3e6   : > { %2840 = vmatpush1.bf16.msra.mxu1 %v5680_v29  ;;  %2926 = vmatpush1.bf16.msra.mxu0 %v5683_v30  ;;  %v5764_v29 = vld [vmem:[#allocation11 + $0x20] ss:$16 sps:$4 sm:$0xff]   ;;  %v5767_v30 = vld [vmem:[#allocation11 + $0x28] ss:$16 sps:$4 sm:$0xff]  }
 0x3e7   : > { %2841 = vmatprep.subr.bf16.mxu1 %v5688_v31  ;;  %2927 = vmatprep.subr.bf16.mxu0 %v5691_v32  ;;  %v5772_v31 = vld [vmem:[#allocation11 + $0x44] ss:$16 sps:$4 sm:$0xff]   ;;  %v5775_v32 = vld [vmem:[#allocation11 + $0x4c] ss:$16 sps:$4 sm:$0xff]  }
 0x3ea   : > { %2842 = vmatpush1.bf16.msra.mxu1 %v5686_v33  ;;  %2928 = vmatpush1.bf16.msra.mxu0 %v5689_v34  ;;  %v5770_v33 = vld [vmem:[#allocation11 + $0x40] ss:$16 sps:$4 sm:$0xff]   ;;  %v5773_v34 = vld [vmem:[#allocation11 + $0x48] ss:$16 sps:$4 sm:$0xff]  }
 0x3eb   : > { %2843 = vmatprep.subr.bf16.mxu1 %v5694_v35  ;;  %2929 = vmatprep.subr.bf16.mxu0 %v5697_v36  ;;  %v5781_v35 = vld [vmem:[#allocation11 + $0x6c] ss:$16 sps:$4 sm:$0xff]   ;;  %v5776_v36 = vld [vmem:[#allocation11 + $0x60] ss:$16 sps:$4 sm:$0xff]  }
 0x3ee   : > { %2844 = vmatpush1.bf16.msra.mxu1 %v5692_v37  ;;  %2930 = vmatpush1.bf16.msra.mxu0 %v5695_v38  ;;  %v5779_v37 = vld [vmem:[#allocation11 + $0x68] ss:$16 sps:$4 sm:$0xff]   ;;  %v5784_v38 = vld [vmem:[#allocation11 + $0x84] ss:$16 sps:$4 sm:$0xff]  }
 0x3ef   : > { %2845 = vmatprep.subr.bf16.mxu1 %v5700_v39  ;;  %2931 = vmatprep.subr.bf16.mxu0 %v5703_v40  ;;  %v5787_v39 = vld [vmem:[#allocation11 + $0x8c] ss:$16 sps:$4 sm:$0xff]   ;;  %v5782_v40 = vld [vmem:[#allocation11 + $0x80] ss:$16 sps:$4 sm:$0xff]  }
 0x3f2   : > { %2846 = vmatpush1.bf16.msra.mxu1 %v5698_v41  ;;  %2932 = vmatpush1.bf16.msra.mxu0 %v5701_v42  ;;  %v5785_v41 = vld [vmem:[#allocation11 + $0x88] ss:$16 sps:$4 sm:$0xff]   ;;  %v5790_v42 = vld [vmem:[#allocation11 + $0xa4] ss:$16 sps:$4 sm:$0xff]  }
 0x3f3   : > { %2847 = vmatprep.subr.bf16.mxu1 %v5706_v43  ;;  %2933 = vmatprep.subr.bf16.mxu0 %v5709_v44  ;;  %v5793_v43 = vld [vmem:[#allocation11 + $0xac] ss:$16 sps:$4 sm:$0xff]   ;;  %v5788_v44 = vld [vmem:[#allocation11 + $0xa0] ss:$16 sps:$4 sm:$0xff]  }
 0x3f6   : > { %2848 = vmatpush1.bf16.msra.mxu1 %v5704_v45  ;;  %2934 = vmatpush1.bf16.msra.mxu0 %v5707_v46  ;;  %v5791_v45 = vld [vmem:[#allocation11 + $0xa8] ss:$16 sps:$4 sm:$0xff]   ;;  %v5796_v46 = vld [vmem:[#allocation11 + $0xc4] ss:$16 sps:$4 sm:$0xff]  }
 0x3f7   : > { %2849 = vmatprep.subr.bf16.mxu1 %v5712_v47  ;;  %2935 = vmatprep.subr.bf16.mxu0 %v5715_v48  ;;  %v5799_v47 = vld [vmem:[#allocation11 + $0xcc] ss:$16 sps:$4 sm:$0xff]   ;;  %v5794_v48 = vld [vmem:[#allocation11 + $0xc0] ss:$16 sps:$4 sm:$0xff]  }
 0x3fa   : > { %2850 = vmatpush1.bf16.msra.mxu1 %v5710_v49  ;;  %2936 = vmatpush1.bf16.msra.mxu0 %v5713_v23  ;;  %v5797_v49 = vld [vmem:[#allocation11 + $0xc8] ss:$16 sps:$4 sm:$0xff]   ;;  %v5802_v23 = vld [vmem:[#allocation11 + $0xe4] ss:$16 sps:$4 sm:$0xff]  }
 0x3fb   : > { %2851 = vmatprep.subr.bf16.mxu1 %v5718_v50  ;;  %2937 = vmatprep.subr.bf16.mxu0 %v5721_v51  ;;  %v5805_v50 = vld [vmem:[#allocation11 + $0xec] ss:$16 sps:$4 sm:$0xff]   ;;  %v5800_v51 = vld [vmem:[#allocation11 + $0xe0] ss:$16 sps:$4 sm:$0xff]  }
 0x3fe   : > { %2852 = vmatpush1.bf16.msra.mxu1 %v5716_v52  ;;  %2938 = vmatpush1.bf16.msra.mxu0 %v5719_v53  ;;  %v5803_v52 = vld [vmem:[#allocation11 + $0xe8] ss:$16 sps:$4 sm:$0xff]   ;;  %v5808_v53 = vld [vmem:[#allocation11 + $0x104] ss:$16 sps:$4 sm:$0xff]  }
 0x3ff   : > { %2853 = vmatprep.subr.bf16.mxu1 %v5724_v54  ;;  %2939 = vmatprep.subr.bf16.mxu0 %v5727_v55  ;;  %v5811_v54 = vld [vmem:[#allocation11 + $0x10c] ss:$16 sps:$4 sm:$0xff]   ;;  %v5806_v55 = vld [vmem:[#allocation11 + $0x100] ss:$16 sps:$4 sm:$0xff]  }
 0x402   : > { %2854 = vmatpush1.bf16.msra.mxu1 %v5722_v56  ;;  %2940 = vmatpush1.bf16.msra.mxu0 %v5725_v57  ;;  %v5809_v56 = vld [vmem:[#allocation11 + $0x108] ss:$16 sps:$4 sm:$0xff]   ;;  %v5814_v57 = vld [vmem:[#allocation11 + $0x124] ss:$16 sps:$4 sm:$0xff]  }
 0x403   : > { %2855 = vmatprep.subr.bf16.mxu1 %v5730_v58  ;;  %2941 = vmatprep.subr.bf16.mxu0 %v5733_v59  ;;  %v5817_v58 = vld [vmem:[#allocation11 + $0x12c] ss:$16 sps:$4 sm:$0xff]   ;;  %v5812_v59 = vld [vmem:[#allocation11 + $0x120] ss:$16 sps:$4 sm:$0xff]  }
 0x406   : > { %2856 = vmatpush1.bf16.msra.mxu1 %v5728_v62  ;;  %2942 = vmatpush1.bf16.msra.mxu0 %v5731_v2  ;;  %v5815_v62 = vld [vmem:[#allocation11 + $0x128] ss:$16 sps:$4 sm:$0xff]   ;;  %v5820_v2 = vld [vmem:[#allocation11 + $0x144] ss:$16 sps:$4 sm:$0xff]  }
 0x407   : > { %2857 = vmatprep.subr.bf16.mxu1 %v5736_v3  ;;  %2943 = vmatprep.subr.bf16.mxu0 %v5739_v4  ;;  %v5823_v3 = vld [vmem:[#allocation11 + $0x14c] ss:$16 sps:$4 sm:$0xff]   ;;  %v5818_v4 = vld [vmem:[#allocation11 + $0x140] ss:$16 sps:$4 sm:$0xff]  }
 0x40a   : > { %2858 = vmatpush1.bf16.msra.mxu1 %v5734_v5  ;;  %2944 = vmatpush1.bf16.msra.mxu0 %v5737_v6  ;;  %v5821_v5 = vld [vmem:[#allocation11 + $0x148] ss:$16 sps:$4 sm:$0xff]   ;;  %v5826_v6 = vld [vmem:[#allocation11 + $0x164] ss:$16 sps:$4 sm:$0xff]  }
 0x40b   : > { %2859 = vmatprep.subr.bf16.mxu1 %v5742_v8  ;;  %2945 = vmatprep.subr.bf16.mxu0 %v5745_v9  ;;  %v5829_v8 = vld [vmem:[#allocation11 + $0x16c] ss:$16 sps:$4 sm:$0xff]   ;;  %v5824_v9 = vld [vmem:[#allocation11 + $0x160] ss:$16 sps:$4 sm:$0xff]  }
 0x40e   : > { %2860 = vmatpush1.bf16.msra.mxu1 %v5740_v10  ;;  %2946 = vmatpush1.bf16.msra.mxu0 %v5743_v11  ;;  %v5827_v10 = vld [vmem:[#allocation11 + $0x168] ss:$16 sps:$4 sm:$0xff]   ;;  %v5832_v11 = vld [vmem:[#allocation11 + $0x184] ss:$16 sps:$4 sm:$0xff]  }
 0x40f   : > { %2861 = vmatprep.subr.bf16.mxu1 %v5748_v12  ;;  %2947 = vmatprep.subr.bf16.mxu0 %v5751_v13  ;;  %v5835_v12 = vld [vmem:[#allocation11 + $0x18c] ss:$16 sps:$4 sm:$0xff]   ;;  %v5830_v13 = vld [vmem:[#allocation11 + $0x180] ss:$16 sps:$4 sm:$0xff]  }
 0x412   : > { %2862 = vmatpush1.bf16.msra.mxu1 %v5746_v14  ;;  %2948 = vmatpush1.bf16.msra.mxu0 %v5749_v15  ;;  %v5833_v14 = vld [vmem:[#allocation11 + $0x188] ss:$16 sps:$4 sm:$0xff]   ;;  %v5838_v15 = vld [vmem:[#allocation11 + $0x1a4] ss:$16 sps:$4 sm:$0xff]  }
 0x413   : > { %2863 = vmatprep.subr.bf16.mxu1 %v5754_v16  ;;  %2949 = vmatprep.subr.bf16.mxu0 %v5757_v17  ;;  %v5841_v16 = vld [vmem:[#allocation11 + $0x1ac] ss:$16 sps:$4 sm:$0xff]   ;;  %v5836_v17 = vld [vmem:[#allocation11 + $0x1a0] ss:$16 sps:$4 sm:$0xff]  }
 0x416   : > { %2864 = vmatpush1.bf16.msra.mxu1 %v5752_v18  ;;  %2950 = vmatpush1.bf16.msra.mxu0 %v5755_v19  ;;  %v5839_v18 = vld [vmem:[#allocation11 + $0x1a8] ss:$16 sps:$4 sm:$0xff]   ;;  %v5844_v19 = vld [vmem:[#allocation11 + $0x1c4] ss:$16 sps:$4 sm:$0xff]  }
 0x417   : > { %3764 = vmatprep.subr.bf16.mxu1 %v5760_v21  ;;  %3850 = vmatprep.subr.bf16.mxu0 %v5763_v22  ;;  %v5842_v21 = vld [vmem:[#allocation11 + $0x1c0] ss:$16 sps:$4 sm:$0xff]   ;;  %v5845_v22 = vld [vmem:[#allocation11 + $0x1c8] ss:$16 sps:$4 sm:$0xff]  }
 0x419   : > { %2866 = vmatmul.mubr.bf16.vlgmr.msra.gmra.mrb[8].mxu1 %v1998_v26  ;;  %2952 = vmatmul.mubr.bf16.vlgmr.msra.gmra.mrb[12].mxu0 %v1998_v26  ;;  %v5848_v26 = vld [vmem:[#allocation11 + $0x1e0] ss:$16 sps:$4 sm:$0xff]  }
 0x41a   : > { %3765 = vmatpush1.bf16.msra.mxu1 %v5758_v24  ;;  %3851 = vmatpush1.bf16.msra.mxu0 %v5761_v25  ;;  %v5850_v24 = vld [vmem:[#allocation11 + $0x1e4] ss:$16 sps:$4 sm:$0xff]   ;;  %v5853_v25 = vld [vmem:[#allocation11 + $0x1ec] ss:$16 sps:$4 sm:$0xff]  }
 0x41b   : > { %3766 = vmatprep.subr.bf16.mxu1 %v5766_v27  ;;  %3852 = vmatprep.subr.bf16.mxu0 %v5769_v28  ;;  %v5851_v27 = vld [vmem:[#allocation11 + $0x1e8] ss:$16 sps:$4 sm:$0xff]   ;;  %v5856_v28 = vld [vmem:[#allocation11 + $0x204] ss:$16 sps:$4 sm:$0xff]  }
 0x41e   : > { %3767 = vmatpush1.bf16.msra.mxu1 %v5764_v29  ;;  %3853 = vmatpush1.bf16.msra.mxu0 %v5767_v30  ;;  %v5859_v29 = vld [vmem:[#allocation11 + $0x20c] ss:$16 sps:$4 sm:$0xff]   ;;  %v2128_v30 = vld [vmem:[%s6777_s8] sm:$0xf] }
 0x41f   : > { %3768 = vmatprep.subr.bf16.mxu1 %v5772_v31  ;;  %3854 = vmatprep.subr.bf16.mxu0 %v5775_v32  ;;  %v2133_v31 = vrot.slane %v2128_v30, %v6637_v60  ;;  %v2141_v32 = vrot.slane %v2128_v30, %v6639_v61 }
 0x422   : > { %3769 = vmatpush1.bf16.msra.mxu1 %v5770_v33  ;;  %3855 = vmatpush1.bf16.msra.mxu0 %v5773_v34 }
 0x423   : > { %3770 = vmatprep.subr.bf16.mxu1 %v5778_v7  ;;  %3856 = vmatprep.subr.bf16.mxu0 %v5781_v35  ;;  %v2137_v7 = vrot.slane %v2128_v30, %v6641_v63  ;;  %v2145_v35 = vrot.slane %v2128_v30, %v6643_v1  ;;  %v5896_v30 = vld [vmem:[#allocation11 + $0x2e0] ss:$16 sps:$4 sm:$0xff]  }
 0x426   : > { %3771 = vmatpush1.bf16.msra.mxu1 %v5776_v36  ;;  %3857 = vmatpush1.bf16.msra.mxu0 %v5779_v37 }
 0x427   : > { %3772 = vmatprep.subr.bf16.mxu1 %v5784_v38  ;;  %3858 = vmatprep.subr.bf16.mxu0 %v5787_v39 }
 0x42a   : > { %3773 = vmatpush1.bf16.msra.mxu1 %v5782_v40  ;;  %3859 = vmatpush1.bf16.msra.mxu0 %v5785_v41 }
 0x42b   : > { %3774 = vmatprep.subr.bf16.mxu1 %v5790_v42  ;;  %3860 = vmatprep.subr.bf16.mxu0 %v5793_v43 }
 0x42e   : > { %3775 = vmatpush1.bf16.msra.mxu1 %v5788_v44  ;;  %3861 = vmatpush1.bf16.msra.mxu0 %v5791_v45 }
 0x42f   : > { %3776 = vmatprep.subr.bf16.mxu1 %v5796_v46  ;;  %3862 = vmatprep.subr.bf16.mxu0 %v5799_v47 }
 0x432   : > { %3777 = vmatpush1.bf16.msra.mxu1 %v5794_v48  ;;  %3863 = vmatpush1.bf16.msra.mxu0 %v5797_v49 }
 0x433   : > { %3778 = vmatprep.subr.bf16.mxu1 %v5802_v23  ;;  %3864 = vmatprep.subr.bf16.mxu0 %v5805_v50 }
 0x436   : > { %3779 = vmatpush1.bf16.msra.mxu1 %v5800_v51  ;;  %3865 = vmatpush1.bf16.msra.mxu0 %v5803_v52 }
 0x437   : > { %3780 = vmatprep.subr.bf16.mxu1 %v5808_v53  ;;  %3866 = vmatprep.subr.bf16.mxu0 %v5811_v54 }
 0x43a   : > { %3781 = vmatpush1.bf16.msra.mxu1 %v5806_v55  ;;  %3867 = vmatpush1.bf16.msra.mxu0 %v5809_v56 }
 0x43b   : > { %3782 = vmatprep.subr.bf16.mxu1 %v5814_v57  ;;  %3868 = vmatprep.subr.bf16.mxu0 %v5817_v58  ;;  %v5854_v57 = vld [vmem:[#allocation11 + $0x200] ss:$16 sps:$4 sm:$0xff]   ;;  %v5857_v58 = vld [vmem:[#allocation11 + $0x208] ss:$16 sps:$4 sm:$0xff]  }
 0x43e   : > { %3783 = vmatpush1.bf16.msra.mxu1 %v5812_v59  ;;  %3869 = vmatpush1.bf16.msra.mxu0 %v5815_v62  ;;  %v5862_v62 = vld [vmem:[#allocation11 + $0x224] ss:$16 sps:$4 sm:$0xff]  }
 0x43f   : > { %3784 = vmatprep.subr.bf16.mxu1 %v5820_v2  ;;  %3870 = vmatprep.subr.bf16.mxu0 %v5823_v3  ;;  %v5865_v2 = vld [vmem:[#allocation11 + $0x22c] ss:$16 sps:$4 sm:$0xff]  }
 0x442   : > { %3785 = vmatpush1.bf16.msra.mxu1 %v5818_v4  ;;  %3871 = vmatpush1.bf16.msra.mxu0 %v5821_v5  ;;  %v5860_v4 = vld [vmem:[#allocation11 + $0x220] ss:$16 sps:$4 sm:$0xff]   ;;  %v5863_v5 = vld [vmem:[#allocation11 + $0x228] ss:$16 sps:$4 sm:$0xff]  }
 0x443   : > { %3786 = vmatprep.subr.bf16.mxu1 %v5826_v6  ;;  %3872 = vmatprep.subr.bf16.mxu0 %v5829_v8  ;;  %v5868_v6 = vld [vmem:[#allocation11 + $0x244] ss:$16 sps:$4 sm:$0xff]   ;;  %v5871_v8 = vld [vmem:[#allocation11 + $0x24c] ss:$16 sps:$4 sm:$0xff]  }
 0x446   : > { %3787 = vmatpush1.bf16.msra.mxu1 %v5824_v9  ;;  %3873 = vmatpush1.bf16.msra.mxu0 %v5827_v10  ;;  %v5866_v9 = vld [vmem:[#allocation11 + $0x240] ss:$16 sps:$4 sm:$0xff]   ;;  %v5869_v10 = vld [vmem:[#allocation11 + $0x248] ss:$16 sps:$4 sm:$0xff]  }
 0x447   : > { %3788 = vmatprep.subr.bf16.mxu1 %v5832_v11  ;;  %3874 = vmatprep.subr.bf16.mxu0 %v5835_v12  ;;  %v5874_v11 = vld [vmem:[#allocation11 + $0x264] ss:$16 sps:$4 sm:$0xff]   ;;  %v5877_v12 = vld [vmem:[#allocation11 + $0x26c] ss:$16 sps:$4 sm:$0xff]  }
 0x44a   : > { %3789 = vmatpush1.bf16.msra.mxu1 %v5830_v13  ;;  %3875 = vmatpush1.bf16.msra.mxu0 %v5833_v14  ;;  %v5872_v13 = vld [vmem:[#allocation11 + $0x260] ss:$16 sps:$4 sm:$0xff]   ;;  %v5875_v14 = vld [vmem:[#allocation11 + $0x268] ss:$16 sps:$4 sm:$0xff]  }
 0x44b   : > { %3790 = vmatprep.subr.bf16.mxu1 %v5838_v15  ;;  %3876 = vmatprep.subr.bf16.mxu0 %v5841_v16  ;;  %v5880_v15 = vld [vmem:[#allocation11 + $0x284] ss:$16 sps:$4 sm:$0xff]   ;;  %v5883_v16 = vld [vmem:[#allocation11 + $0x28c] ss:$16 sps:$4 sm:$0xff]  }
 0x44e   : > { %3791 = vmatpush1.bf16.msra.mxu1 %v5836_v17  ;;  %3877 = vmatpush1.bf16.msra.mxu0 %v5839_v18  ;;  %v5878_v17 = vld [vmem:[#allocation11 + $0x280] ss:$16 sps:$4 sm:$0xff]   ;;  %v5881_v18 = vld [vmem:[#allocation11 + $0x288] ss:$16 sps:$4 sm:$0xff]  }
 0x44f   : > { %3792 = vmatprep.subr.bf16.mxu1 %v5844_v19  ;;  %3878 = vmatprep.subr.bf16.mxu0 %v5847_v20  ;;  %v5886_v19 = vld [vmem:[#allocation11 + $0x2a4] ss:$16 sps:$4 sm:$0xff]   ;;  %v5889_v20 = vld [vmem:[#allocation11 + $0x2ac] ss:$16 sps:$4 sm:$0xff]  }
 0x452   : > { %3793 = vmatpush1.bf16.msra.mxu1 %v5842_v21  ;;  %3879 = vmatpush1.bf16.msra.mxu0 %v5845_v22  ;;  %v5884_v21 = vld [vmem:[#allocation11 + $0x2a0] ss:$16 sps:$4 sm:$0xff]   ;;  %v5887_v22 = vld [vmem:[#allocation11 + $0x2a8] ss:$16 sps:$4 sm:$0xff]  }
 0x453   : > { %3794 = vmatprep.subr.bf16.mxu1 %v5850_v24  ;;  %3880 = vmatprep.subr.bf16.mxu0 %v5853_v25  ;;  %v5892_v24 = vld [vmem:[#allocation11 + $0x2c4] ss:$16 sps:$4 sm:$0xff]   ;;  %v5895_v25 = vld [vmem:[#allocation11 + $0x2cc] ss:$16 sps:$4 sm:$0xff]  }
 0x456   : > { %3795 = vmatpush1.bf16.msra.mxu1 %v5848_v26  ;;  %3881 = vmatpush1.bf16.msra.mxu0 %v5851_v27  ;;  %v5890_v26 = vld [vmem:[#allocation11 + $0x2c0] ss:$16 sps:$4 sm:$0xff]   ;;  %v5893_v27 = vld [vmem:[#allocation11 + $0x2c8] ss:$16 sps:$4 sm:$0xff]  }
 0x457   : > { %3807 = vmatprep.subr.bf16.mxu1 %v5856_v28  ;;  %3893 = vmatprep.subr.bf16.mxu0 %v5859_v29  ;;  %v5898_v28 = vld [vmem:[#allocation11 + $0x2e4] ss:$16 sps:$4 sm:$0xff]   ;;  %v5901_v29 = vld [vmem:[#allocation11 + $0x2ec] ss:$16 sps:$4 sm:$0xff]  }
 0x4ec   : > { %v2867_v33 = vpop.f32.mrb[8].mxu1  ;;  %v2953_v34 = vpop.f32.mrb[12].mxu0 }
 0x4ed   : > { %v2869_v36 = vpop.f32.mrb[9].mxu1  ;;  %v2955_v37 = vpop.f32.mrb[13].mxu0  ;;  %v5159_v40 = vadd.f32 %v2867_v33, %v2133_v31  ;;  %v5163_v41 = vadd.f32 %v2953_v34, %v2141_v32  ;;  %v5907_v33 = vld [vmem:[#allocation11 + $0x30c] ss:$16 sps:$4 sm:$0xff]   ;;  %v5902_v34 = vld [vmem:[#allocation11 + $0x300] ss:$16 sps:$4 sm:$0xff]  }
 0x4ee   : > { %v2871_v38 = vpop.f32.mrb[10].mxu1  ;;  %v2957_v39 = vpop.f32.mrb[14].mxu0  ;;  %v5160_v46 = vadd.f32 %v2869_v36, %v2137_v7  ;;  %v5164_v47 = vadd.f32 %v2955_v37, %v2145_v35  ;;  %v5913_v36 = vld [vmem:[#allocation11 + $0x32c] ss:$16 sps:$4 sm:$0xff]   ;;  %v5908_v37 = vld [vmem:[#allocation11 + $0x320] ss:$16 sps:$4 sm:$0xff]  }
 0x4ef   : > { %v5161_v42 = vadd.f32 %v2871_v38, %v2133_v31  ;;  %v5165_v43 = vadd.f32 %v2957_v39, %v2141_v32  ;;  %v2873_v44 = vpop.f32.mrb[11].mxu1  ;;  %v2959_v45 = vpop.f32.mrb[15].mxu0  ;;  %v5899_v31 = vld [vmem:[#allocation11 + $0x2e8] ss:$16 sps:$4 sm:$0xff]   ;;  %v5904_v32 = vld [vmem:[#allocation11 + $0x304] ss:$16 sps:$4 sm:$0xff]  }
 0x4f0   : > { %v5162_v48 = vadd.f32 %v2873_v44, %v2137_v7  ;;  %v5166_v49 = vadd.f32 %v2959_v45, %v2145_v35  ;;  %v5905_v7 = vld [vmem:[#allocation11 + $0x308] ss:$16 sps:$4 sm:$0xff]   ;;  %v5910_v35 = vld [vmem:[#allocation11 + $0x324] ss:$16 sps:$4 sm:$0xff]   ;;  %v5925_v44 = vld [vmem:[#allocation11 + $0x36c] ss:$16 sps:$4 sm:$0xff]  }
 0x4f1   : > { %v2962_v23 = vpack.c.bf16 %v5161_v42, %v5159_v40  ;;  %v6668_v50 = vpack.c.bf16 %v5165_v43, %v5163_v41  ;;  %v5911_v38 = vld [vmem:[#allocation11 + $0x328] ss:$16 sps:$4 sm:$0xff]   ;;  %v5916_v39 = vld [vmem:[#allocation11 + $0x344] ss:$16 sps:$4 sm:$0xff]   ;;  %v5919_v40 = vld [vmem:[#allocation11 + $0x34c] ss:$16 sps:$4 sm:$0xff]  }
 0x4f2   : > { %v2963_v51 = vpack.c.bf16 %v5162_v48, %v5160_v46  ;;  %v2965_v52 = vpack.c.bf16 %v5166_v49, %v5164_v47  ;;  %v5914_v41 = vld [vmem:[#allocation11 + $0x340] ss:$16 sps:$4 sm:$0xff]   ;;  %v5917_v42 = vld [vmem:[#allocation11 + $0x348] ss:$16 sps:$4 sm:$0xff]   ;;  %v5922_v43 = vld [vmem:[#allocation11 + $0x364] ss:$16 sps:$4 sm:$0xff]  }
 0x4f3   : > { %v2966_v53 = vmul.bf16 1009007652, %v2962_v23  ;;  %v5920_v45 = vld [vmem:[#allocation11 + $0x360] ss:$16 sps:$4 sm:$0xff]   ;;  %v5923_v46 = vld [vmem:[#allocation11 + $0x368] ss:$16 sps:$4 sm:$0xff]  }
 0x4f4   : > { %v2967_v54 = vmul.bf16 1009007652, %v2963_v51  ;;  %v2969_v55 = vmul.bf16 1009007652, %v2965_v52  ;;  %v5928_v47 = vld [vmem:[#allocation11 + $0x384] ss:$16 sps:$4 sm:$0xff]  }
 0x4f5   : > { %v2970_v59 = vmax.bf16 %v2966_v53, %v2962_v23  ;;  %v5931_v48 = vld [vmem:[#allocation11 + $0x38c] ss:$16 sps:$4 sm:$0xff]   ;;  %v5926_v49 = vld [vmem:[#allocation11 + $0x380] ss:$16 sps:$4 sm:$0xff]   ;;  %v5929_v23 = vld [vmem:[#allocation11 + $0x388] ss:$16 sps:$4 sm:$0xff]  }
 0x4f6   : > { %v2971_v56 = vmax.bf16 %v2967_v54, %v2963_v51  ;;  %v2973_v3 = vmax.bf16 %v2969_v55, %v2965_v52  ;;  %v5934_v51 = vld [vmem:[#allocation11 + $0x3a4] ss:$16 sps:$4 sm:$0xff]   ;;  %v5937_v52 = vld [vmem:[#allocation11 + $0x3ac] ss:$16 sps:$4 sm:$0xff]   ;;  %v5932_v53 = vld [vmem:[#allocation11 + $0x3a0] ss:$16 sps:$4 sm:$0xff]  }
 0x4f7   : > { %v5935_v54 = vld [vmem:[#allocation11 + $0x3a8] ss:$16 sps:$4 sm:$0xff]   ;;  %v5940_v55 = vld [vmem:[#allocation11 + $0x3c4] ss:$16 sps:$4 sm:$0xff]  }
 0x4f8   : > { %3796 = vmatprep.mubr.bf16.mxu1 %v2971_v56  ;;  %3882 = vmatprep.mubr.bf16.mxu0 %v2971_v56  ;;  %v5943_v56 = vld [vmem:[#allocation11 + $0x3cc] ss:$16 sps:$4 sm:$0xff]  }
 0x4f9   : > { %3797 = vmatmul.mubr.bf16.vlgmr.msra.gmra.mrb[12].mxu1 %v2970_v59  ;;  %3883 = vmatmul.mubr.bf16.vlgmr.msra.gmra.mrb[16].mxu0 %v2970_v59  ;;  %v5946_v59 = vld [vmem:[#allocation11 + $0x3e4] ss:$16 sps:$4 sm:$0xff]  }
 0x4fa   : > { %3808 = vmatpush1.bf16.msra.mxu1 %v5854_v57  ;;  %3894 = vmatpush1.bf16.msra.mxu0 %v5857_v58  ;;  %v5938_v57 = vld [vmem:[#allocation11 + $0x3c0] ss:$16 sps:$4 sm:$0xff]   ;;  %v5941_v58 = vld [vmem:[#allocation11 + $0x3c8] ss:$16 sps:$4 sm:$0xff]  }
 0x4fb   : > { %3839 = vmatprep.mubr.bf16.mxu1 %v2973_v3  ;;  %3925 = vmatprep.mubr.bf16.mxu0 %v2973_v3  ;;  %v5947_v3 = vld [vmem:[#allocation11 + $0x3e8] ss:$16 sps:$4 sm:$0xff]  }
 0x4fc   : > { %3809 = vmatprep.subr.bf16.mxu1 %v5862_v62  ;;  %3895 = vmatprep.subr.bf16.mxu0 %v5865_v2  ;;  %v5949_v62 = vld [vmem:[#allocation11 + $0x3ec] ss:$16 sps:$4 sm:$0xff]   ;;  %v5944_v2 = vld [vmem:[#allocation11 + $0x3e0] ss:$16 sps:$4 sm:$0xff]  }
 0x4fe   : > { %3810 = vmatpush1.bf16.msra.mxu1 %v5860_v4  ;;  %3896 = vmatpush1.bf16.msra.mxu0 %v5863_v5  ;;  %v2968_v4 = vmul.bf16 1009007652, %v6668_v50  ;;  %v5950_v5 = vld [vmem:[#allocation13 + $0x40] sm:$0xff]  }
 0x4ff   : > { %3811 = vmatprep.subr.bf16.mxu1 %v5868_v6  ;;  %3897 = vmatprep.subr.bf16.mxu0 %v5871_v8  ;;  %v5951_v6 = vld [vmem:[#allocation13 + $0xc0] sm:$0xff]  }
 0x500   : > { %v5952_v8 = vld [vmem:[#allocation13] sm:$0xff]  }
 0x502   : > { %3812 = vmatpush1.bf16.msra.mxu1 %v5866_v9  ;;  %3898 = vmatpush1.bf16.msra.mxu0 %v5869_v10  ;;  %v5953_v9 = vld [vmem:[#allocation13 + $0x80] sm:$0xff]   ;;  %v2972_v10 = vmax.bf16 %v2968_v4, %v6668_v50  ;;  %v5962_v50 = vld [vmem:[#allocation13 + $0x58] sm:$0xff]  }
 0x503   : > { %3813 = vmatprep.subr.bf16.mxu1 %v5874_v11  ;;  %3899 = vmatprep.subr.bf16.mxu0 %v5877_v12  ;;  %v5954_v11 = vld [vmem:[#allocation13 + $0x48] sm:$0xff]  }
 0x504   : > { %v5955_v12 = vld [vmem:[#allocation13 + $0xc8] sm:$0xff]  }
 0x506   : > { %3814 = vmatpush1.bf16.msra.mxu1 %v5872_v13  ;;  %3900 = vmatpush1.bf16.msra.mxu0 %v5875_v14  ;;  %v5956_v13 = vld [vmem:[#allocation13 + $0x8] sm:$0xff]  }
 0x507   : > { %3815 = vmatprep.subr.bf16.mxu1 %v5880_v15  ;;  %3901 = vmatprep.subr.bf16.mxu0 %v5883_v16  ;;  %v5957_v14 = vld [vmem:[#allocation13 + $0x88] sm:$0xff]   ;;  %v5958_v15 = vld [vmem:[#allocation13 + $0x50] sm:$0xff]  }
 0x508   : > { %v5959_v16 = vld [vmem:[#allocation13 + $0xd0] sm:$0xff]  }
 0x50a   : > { %3816 = vmatpush1.bf16.msra.mxu1 %v5878_v17  ;;  %3902 = vmatpush1.bf16.msra.mxu0 %v5881_v18  ;;  %v5960_v17 = vld [vmem:[#allocation13 + $0x10] sm:$0xff]  }
 0x50b   : > { %3817 = vmatprep.subr.bf16.mxu1 %v5886_v19  ;;  %3903 = vmatprep.subr.bf16.mxu0 %v5889_v20  ;;  %v5961_v18 = vld [vmem:[#allocation13 + $0x90] sm:$0xff]   ;;  %v5963_v19 = vld [vmem:[#allocation13 + $0xd8] sm:$0xff]  }
 0x50c   : > { %v5964_v20 = vld [vmem:[#allocation13 + $0x18] sm:$0xff]  }
 0x50e   : > { %3818 = vmatpush1.bf16.msra.mxu1 %v5884_v21  ;;  %3904 = vmatpush1.bf16.msra.mxu0 %v5887_v22  ;;  %v5965_v21 = vld [vmem:[#allocation13 + $0x98] sm:$0xff]   ;;  %v5966_v22 = vld [vmem:[#allocation13 + $0x60] sm:$0xff]  }
 0x50f   : > { %3819 = vmatprep.subr.bf16.mxu1 %v5892_v24  ;;  %3905 = vmatprep.subr.bf16.mxu0 %v5895_v25  ;;  %v5967_v24 = vld [vmem:[#allocation13 + $0xe0] sm:$0xff]  }
 0x510   : > { %v5968_v25 = vld [vmem:[#allocation13 + $0x20] sm:$0xff]  }
 0x512   : > { %3820 = vmatpush1.bf16.msra.mxu1 %v5890_v26  ;;  %3906 = vmatpush1.bf16.msra.mxu0 %v5893_v27  ;;  %v5969_v26 = vld [vmem:[#allocation13 + $0xa0] sm:$0xff]   ;;  %v5970_v27 = vld [vmem:[#allocation13 + $0x68] sm:$0xff]  }
 0x513   : > { %3821 = vmatprep.subr.bf16.mxu1 %v5898_v28  ;;  %3907 = vmatprep.subr.bf16.mxu0 %v5901_v29  ;;  %v5971_v28 = vld [vmem:[#allocation13 + $0xe8] sm:$0xff]  }
 0x514   : > { %v5972_v29 = vld [vmem:[#allocation13 + $0x28] sm:$0xff]  }
 0x516   : > { %3822 = vmatpush1.bf16.msra.mxu1 %v5896_v30  ;;  %3908 = vmatpush1.bf16.msra.mxu0 %v5899_v31  ;;  %v5973_v30 = vld [vmem:[#allocation13 + $0xa8] sm:$0xff]   ;;  %v5974_v31 = vld [vmem:[#allocation13 + $0x70] sm:$0xff]  }
 0x517   : > { %3823 = vmatprep.subr.bf16.mxu1 %v5904_v32  ;;  %3909 = vmatprep.subr.bf16.mxu0 %v5907_v33  ;;  %v5975_v32 = vld [vmem:[#allocation13 + $0xf0] sm:$0xff]  }
 0x518   : > { %v5976_v33 = vld [vmem:[#allocation13 + $0x30] sm:$0xff]  }
 0x51a   : > { %3824 = vmatpush1.bf16.msra.mxu1 %v5902_v34  ;;  %3910 = vmatpush1.bf16.msra.mxu0 %v5905_v7  ;;  %v5977_v34 = vld [vmem:[#allocation13 + $0xb0] sm:$0xff]   ;;  %v5978_v7 = vld [vmem:[#allocation13 + $0x78] sm:$0xff]  }
 0x51b   : > { %3825 = vmatprep.subr.bf16.mxu1 %v5910_v35  ;;  %3911 = vmatprep.subr.bf16.mxu0 %v5913_v36  ;;  %v5979_v35 = vld [vmem:[#allocation13 + $0xf8] sm:$0xff]  }
 0x51c   : > { %v5980_v36 = vld [vmem:[#allocation13 + $0x38] sm:$0xff]  }
 0x51e   : > { %3826 = vmatpush1.bf16.msra.mxu1 %v5908_v37  ;;  %3912 = vmatpush1.bf16.msra.mxu0 %v5911_v38  ;;  %v5981_v37 = vld [vmem:[#allocation13 + $0xb8] sm:$0xff]  }
 0x51f   : > { %3827 = vmatprep.subr.bf16.mxu1 %v5916_v39  ;;  %3913 = vmatprep.subr.bf16.mxu0 %v5919_v40  ;;  %v3102_v38 = vld [vmem:[%s6779_s10] sm:$0xf] }
 0x520   : > { %v3107_v39 = vrot.slane %v3102_v38, %v6637_v60  ;;  %v3115_v40 = vrot.slane %v3102_v38, %v6639_v61 }
 0x522   : > { %3828 = vmatpush1.bf16.msra.mxu1 %v5914_v41  ;;  %3914 = vmatpush1.bf16.msra.mxu0 %v5917_v42 }
 0x523   : > { %3829 = vmatprep.subr.bf16.mxu1 %v5922_v43  ;;  %3915 = vmatprep.subr.bf16.mxu0 %v5925_v44  ;;  %v3111_v43 = vrot.slane %v3102_v38, %v6641_v63  ;;  %v3119_v44 = vrot.slane %v3102_v38, %v6643_v1 }
 0x526   : > { %3830 = vmatpush1.bf16.msra.mxu1 %v5920_v45  ;;  %3916 = vmatpush1.bf16.msra.mxu0 %v5923_v46 }
 0x527   : > { %3831 = vmatprep.subr.bf16.mxu1 %v5928_v47  ;;  %3917 = vmatprep.subr.bf16.mxu0 %v5931_v48 }
 0x52a   : > { %3832 = vmatpush1.bf16.msra.mxu1 %v5926_v49  ;;  %3918 = vmatpush1.bf16.msra.mxu0 %v5929_v23 }
 0x52b   : > { %3833 = vmatprep.subr.bf16.mxu1 %v5934_v51  ;;  %3919 = vmatprep.subr.bf16.mxu0 %v5937_v52 }
 0x52e   : > { %3834 = vmatpush1.bf16.msra.mxu1 %v5932_v53  ;;  %3920 = vmatpush1.bf16.msra.mxu0 %v5935_v54 }
 0x52f   : > { %3835 = vmatprep.subr.bf16.mxu1 %v5940_v55  ;;  %3921 = vmatprep.subr.bf16.mxu0 %v5943_v56 }
 0x532   : > { %3836 = vmatpush1.bf16.msra.mxu1 %v5938_v57  ;;  %3922 = vmatpush1.bf16.msra.mxu0 %v5941_v58 }
 0x533   : > { %3837 = vmatprep.subr.bf16.mxu1 %v5946_v59  ;;  %3923 = vmatprep.subr.bf16.mxu0 %v5949_v62 }
 0x536   : > { %3838 = vmatpush1.bf16.msra.mxu1 %v5944_v2  ;;  %3924 = vmatpush1.bf16.msra.mxu0 %v5947_v3 }
 0x537   : > { %5058 = vmatprep.subr.bf16.mxu1 %v5950_v5  ;;  %5080 = vmatprep.subr.bf16.mxu0 %v5951_v6  ;;  %v5982_v6 = vld [vmem:[%s6782_s13] sm:$0xff]  }
 0x539   : > { %3840 = vmatmul.mubr.bf16.vlgmr.msra.gmra.mrb[12].mxu1 %v2972_v10  ;;  %3926 = vmatmul.mubr.bf16.vlgmr.msra.gmra.mrb[16].mxu0 %v2972_v10  ;;  %v5983_v10 = vld [vmem:[%s6782_s13 + $0x8] sm:$0xff]  }
 0x53a   : > { %5059 = vmatpush3.bf16.msra.mxu1 %v5952_v8  ;;  %5081 = vmatpush3.bf16.msra.mxu0 %v5953_v9 }
 0x53b   : > { %5060 = vmatprep.subr.bf16.mxu1 %v5954_v11  ;;  %5082 = vmatprep.subr.bf16.mxu0 %v5955_v12  ;;  %v5984_v11 = vld [vmem:[%s6782_s13 + $0x10] sm:$0xff]   ;;  %v5985_v12 = vld [vmem:[%s6782_s13 + $0x18] sm:$0xff]  }
 0x53e   : > { %5061 = vmatpush3.bf16.msra.mxu1 %v5956_v13  ;;  %5083 = vmatpush3.bf16.msra.mxu0 %v5957_v14  ;;  %v5986_v13 = vld [vmem:[%s6782_s13 + $0x20] sm:$0xff]   ;;  %v5987_v14 = vld [vmem:[%s6782_s13 + $0x28] sm:$0xff]  }
 0x53f   : > { %5062 = vmatprep.subr.bf16.mxu1 %v5958_v15  ;;  %5084 = vmatprep.subr.bf16.mxu0 %v5959_v16  ;;  %v5988_v15 = vld [vmem:[%s6782_s13 + $0x30] sm:$0xff]   ;;  %v5989_v16 = vld [vmem:[%s6782_s13 + $0x38] sm:$0xff]  }
 0x542   : > { %5063 = vmatpush3.bf16.msra.mxu1 %v5960_v17  ;;  %5085 = vmatpush3.bf16.msra.mxu0 %v5961_v18 }
 0x543   : > { %5064 = vmatprep.subr.bf16.mxu1 %v5962_v50  ;;  %5086 = vmatprep.subr.bf16.mxu0 %v5963_v19  ;;  %v5001_v50 = vld [vmem:[%s6827_s20] ss:$0 sm:$0xff] }
 0x546   : > { %5065 = vmatpush3.bf16.msra.mxu1 %v5964_v20  ;;  %5087 = vmatpush3.bf16.msra.mxu0 %v5965_v21 }
 0x547   : > { %5066 = vmatprep.subr.bf16.mxu1 %v5966_v22  ;;  %5088 = vmatprep.subr.bf16.mxu0 %v5967_v24 }
 0x54a   : > { %5067 = vmatpush3.bf16.msra.mxu1 %v5968_v25  ;;  %5089 = vmatpush3.bf16.msra.mxu0 %v5969_v26 }
 0x54b   : > { %5068 = vmatprep.subr.bf16.mxu1 %v5970_v27  ;;  %5090 = vmatprep.subr.bf16.mxu0 %v5971_v28 }
 0x54e   : > { %5069 = vmatpush3.bf16.msra.mxu1 %v5972_v29  ;;  %5091 = vmatpush3.bf16.msra.mxu0 %v5973_v30 }
 0x54f   : > { %5070 = vmatprep.subr.bf16.mxu1 %v5974_v31  ;;  %5092 = vmatprep.subr.bf16.mxu0 %v5975_v32 }
 0x552   : > { %5071 = vmatpush3.bf16.msra.mxu1 %v5976_v33  ;;  %5093 = vmatpush3.bf16.msra.mxu0 %v5977_v34 }
 0x553   : > { %5072 = vmatprep.subr.bf16.mxu1 %v5978_v7  ;;  %5094 = vmatprep.subr.bf16.mxu0 %v5979_v35  ;;  %v5034_v35 = vld [vmem:[%s6829_s29] ss:$0 sm:$0xff] }
 0x556   : > { %5073 = vmatpush3.bf16.msra.mxu1 %v5980_v36  ;;  %5095 = vmatpush3.bf16.msra.mxu0 %v5981_v37 }
 0x557   : > { %5131 = vmatprep.subr.bf16.mxu1 %v6277_v0 }
 0x60c   : > { %v3841_v41 = vpop.f32.mrb[12].mxu1  ;;  %v3927_v42 = vpop.f32.mrb[16].mxu0 }
 0x60d   : > { %v3843_v45 = vpop.f32.mrb[13].mxu1  ;;  %v3929_v46 = vpop.f32.mrb[17].mxu0  ;;  %v5167_v49 = vadd.f32 %v3841_v41, %v3107_v39  ;;  %v5171_v23 = vadd.f32 %v3927_v42, %v3115_v40 }
 0x60e   : > { %v3845_v47 = vpop.f32.mrb[14].mxu1  ;;  %v3931_v48 = vpop.f32.mrb[18].mxu0  ;;  %v5168_v55 = vadd.f32 %v3843_v45, %v3111_v43  ;;  %v5172_v60 = vadd.f32 %v3929_v46, %v3119_v44 }
 0x60f   : > { %v5169_v51 = vadd.f32 %v3845_v47, %v3107_v39  ;;  %v5173_v52 = vadd.f32 %v3931_v48, %v3115_v40  ;;  %v3847_v53 = vpop.f32.mrb[15].mxu1  ;;  %v3933_v54 = vpop.f32.mrb[19].mxu0 }
 0x610   : > { %v5170_v56 = vadd.f32 %v3847_v53, %v3111_v43  ;;  %v5174_v61 = vadd.f32 %v3933_v54, %v3119_v44 }
 0x611   : > { %v3936_v57 = vpack.c.bf16 %v5169_v51, %v5167_v49  ;;  %v3938_v58 = vpack.c.bf16 %v5173_v52, %v5171_v23 }
 0x612   : > { %v3937_v59 = vpack.c.bf16 %v5170_v56, %v5168_v55  ;;  %v3939_v63 = vpack.c.bf16 %v5174_v61, %v5172_v60 }
 0x613   : > { %v3940_v62 = vmul.bf16 1009007652, %v3936_v57  ;;  %v3942_v1 = vmul.bf16 1009007652, %v3938_v58 }
 0x614   : > { %v3941_v2 = vmul.bf16 1009007652, %v3937_v59  ;;  %v3943_v3 = vmul.bf16 1009007652, %v3939_v63 }
 0x615   : > { %v3944_v8 = vmax.bf16 %v3940_v62, %v3936_v57  ;;  %v3946_v9 = vmax.bf16 %v3942_v1, %v3938_v58 }
 0x616   : > { %v3945_v4 = vmax.bf16 %v3941_v2, %v3937_v59  ;;  %v3947_v5 = vmax.bf16 %v3943_v3, %v3939_v63 }
 0x618   : > { %4243 = vmatprep.mubr.bf16.mxu1 %v3945_v4  ;;  %4284 = vmatprep.mubr.bf16.mxu0 %v3947_v5 }
 0x619   : > { %4244 = vmatmul.mubr.bf16.vlgmr.msra.gmra.mrb[16].mxu1 %v3944_v8  ;;  %4285 = vmatmul.mubr.bf16.vlgmr.msra.gmra.mrb[20].mxu0 %v3946_v9 }
 0x61a   : > { %5132 = vmatpush3.bf16.msra.mxu1 %v5982_v6  ;;  %5147 = vmatprep.mubr.msk.bf16.mxu1 %vm6278_vm0, %v6277_v0 }
 0x61b   : > { %5133 = vmatprep.subr.bf16.mxu1 %v6277_v0 }
 0x61e   : > { %5134 = vmatpush3.bf16.msra.mxu1 %v5983_v10 }
 0x61f   : > { %5135 = vmatprep.subr.bf16.mxu1 %v6277_v0 }
 0x622   : > { %5136 = vmatpush3.bf16.msra.mxu1 %v5984_v11 }
 0x623   : > { %5137 = vmatprep.subr.bf16.mxu1 %v6277_v0 }
 0x626   : > { %5138 = vmatpush3.bf16.msra.mxu1 %v5985_v12 }
 0x627   : > { %5139 = vmatprep.subr.bf16.mxu1 %v6277_v0 }
 0x62a   : > { %5140 = vmatpush3.bf16.msra.mxu1 %v5986_v13 }
 0x62b   : > { %5141 = vmatprep.subr.bf16.mxu1 %v6277_v0 }
 0x62e   : > { %5142 = vmatpush3.bf16.msra.mxu1 %v5987_v14 }
 0x62f   : > { %5143 = vmatprep.subr.bf16.mxu1 %v6277_v0 }
 0x632   : > { %5144 = vmatpush3.bf16.msra.mxu1 %v5988_v15 }
 0x633   : > { %5145 = vmatprep.subr.bf16.mxu1 %v6277_v0 }
 0x636   : > { %5146 = vmatpush3.bf16.msra.mxu1 %v5989_v16 }
 0x6ec   : > { %v5074_v17 = vpop.f32.mrb[16].mxu1  ;;  %v5096_v18 = vpop.f32.mrb[20].mxu0 }
 0x6ed   : > { %v5075_v19 = vpop.f32.mrb[17].mxu1  ;;  %v5097_v20 = vpop.f32.mrb[21].mxu0 }
 0x6ee   : > { %v5076_v21 = vadd.f32 %v5075_v19, %v5074_v17  ;;  %v5098_v22 = vadd.f32 %v5097_v20, %v5096_v18  ;;  %v5077_v24 = vpop.f32.mrb[18].mxu1  ;;  %v5099_v25 = vpop.f32.mrb[22].mxu0 }
 0x6ef   : > { %v5078_v26 = vpop.f32.mrb[19].mxu1  ;;  %v5100_v0 = vpop.f32.mrb[23].mxu0 }
 0x6f0   : > { %v4246_v27 = vadd.f32 %v5076_v21, %v5001_v50  ;;  %v5079_v28 = vadd.f32 %v5078_v26, %v5077_v24  ;;  %v5101_v29 = vadd.f32 %v5100_v0, %v5099_v25 }
 0x6f2   : > { %v4287_v30 = vadd.f32 %v5098_v22, %v4246_v27  ;;  %v4249_v31 = vadd.f32 %v5079_v28, %v5001_v50 }
 0x6f4   : > { %v4290_v32 = vadd.f32 %v5101_v29, %v4249_v31 }
 0x6f6   : > { %v4293_v33 = vpack.c.bf16 %v4290_v32, %v4287_v30 }
 0x6f8   : > { %v4294_v34 = vmul.bf16 1009007652, %v4293_v33 }
 0x6fa   : > { %v4295_v7 = vmax.bf16 %v4294_v34, %v4293_v33 }
 0x6fc   : > { %5148 = vmatmul.mubr.bf16.vlgmr.msra.gmra.mrb[20].mxu1 %v4295_v7 }
 0x7cf   : > { %v4401_v36 = vpop.f32.mrb[20].mxu1 }
 0x7d0   : > { %v4402_v37 = vadd.f32 %v5034_v35, %v4401_v36  ;;  %v5149_v38 = vpop.f32.mrb[21].mxu1 }
 0x7d1   : > { %v4404_v39 = vpop.f32.mrb[22].mxu1 }
 0x7d2   : > { %4408 = vst [vmem:[%s586_s27] sm:$0xff] %v4402_v37  ;;  %v4405_v40 = vadd.f32 %v5034_v35, %v4404_v39  ;;  %v5150_v41 = vpop.f32.mrb[23].mxu1 }
 0x7d4   : > { %4409 = vst [vmem:[%s586_s27 + $0x8] sm:$0xff] %v4405_v40 }
 0x7d5   : > { %6199 = shalt.err (!%p6196_p6)
}
 0x7d6   : > { %s6200_s20 = scalar_lea.hbm %s6726_s23, 256  ;;  %s6204_s28 = scalar_lea.hbm %s6831_s26, 512 }
 0x7d7   : > { %p6201_p5 = scmp.ne.s32.totalorder %s6726_s23, %s6200_s20  ;;  %p6205_p10 = scmp.lt.u32.totalorder %s6726_s23, %s6831_s26 }
 0x7d8   : > { %p6206_p2 = scmp.lt.u32.totalorder %s6204_s28, %s6200_s20  ;;  %p6208_p4 = scmp.lt.u32.totalorder %s6200_s20, %s6726_s23 }
 0x7d9   : > { %p6202_p9 = pnand %p6201_p5, %p6832_p7 }
 0x7da   : > { %p6207_p3 = por %p6206_p2, %p6205_p10 }
 0x7db   : > { %p6203_p12 = pneg %p6202_p9 }
 0x7dc   : > { %p6209_p8 = por %p6208_p4, %p6207_p3 }
 0x7de   : > { %p6210_p11 = pnand %p6209_p8, %p6203_p12 }
 0x7e0   : > { %6213 = shalt.err (!%p6210_p11)
}
 0x7e1   : > { %s6281_s29 = smov 128   ;;  %s6282_s27 = smov 8  }
 0x7e2   : > { %5227 = dma.vmem_to_hbm [thread:$0]  (%p6832_p7), %s6721_s14, 256, %s6726_s23, %s6728_s12, %s6281_s29, %s6281_s29, %s6282_s27  }
 0x7e3 PF: > { %s6833_s4 = sld [smem:[#allocation23_spill]]  ;;  %s6834_s24 = sld [smem:[#allocation20_spill]] }
 0x7e4   : > { %s6835_s30 = sld [smem:[#allocation27_spill]] }
 0x7e9   : > { %p5269_p13 = scmp.ge.s32.totalorder %s6833_s4, 2  ;;  %s4439_s22 = sand.u32 1, %s6834_s24  }
 0x7ea   : > { %p6836_p1 = scmp.ne.s32.totalorder %s6835_s30, 0  ;;  %s4440_s16 = scalar_lea.sflag [#allocation4], %s4439_s22 }
 0x7ec   : > { %p5252_p0 = pnand %p5269_p13, %p6836_p1 }
 0x7ee   : > { %6247 = dma.done.wait (!%p5252_p0), %s4440_s16, 256  }
 0x7ef   : > { %6249 = vsyncadd (!%p5252_p0), %s4440_s16, 4294967040  ;;  %s6837_s21 = sld [smem:[#allocation24_spill]]  ;;  %s6838_s18 = sld [smem:[#allocation21_spill]] }
 0x7f0   : > { %s6839_s19 = sld [smem:[#allocation22_spill]]  ;;  %s6840_s20 = sld [smem:[#allocation25_spill]] }
 0x7f5   : > { %p29_p6 = scmp.ge.s32.totalorder %s6837_s21, 4  }
 0x7f7   :  { %31 = sbr.rel (!%p29_p6) target bundleno = 13 (0xd), region = 144 }
 0x7fe   :  { %4445 = vsyncpa [#allocation3], 1 }
 0x7ff   :  { %4447 = vsyncpa [#allocation3 + $0x1], 1 }
 0x800   :  { %4448 = vsyncpa [#allocation6], 1 }
 0x801   :  { %4449 = vsyncpa [#allocation9], 1 }
 0x802   :  { %4450 = vsyncpa [#allocation12], 1 }
 0x803   :  { %4451 = vsyncpa [#allocation4], 1 }
 0x804   :  { %4453 = vsyncpa [#allocation4 + $0x1], 1 }

</bundles_post_ra>
